<compile_context>
chip_gen: v6e
topology: v6e:2x2x1
jax: 0.10.0
libtpu: 0.0.40
codegen_flags: <defaults>
</compile_context>

<pallas_src>
import jax
import jax.numpy as jnp
from jax.experimental import pallas as pl
from jax.experimental.pallas import tpu as pltpu

IN_DIM = 28 * 28                      # 784
ENC_DIMS = [IN_DIM, 128, 64, 32, 3]
DEC_DIMS = [3, 32, 64, 128, IN_DIM]
LAYER_DIMS = list(zip(ENC_DIMS[:-1], ENC_DIMS[1:])) + list(zip(DEC_DIMS[:-1], DEC_DIMS[1:]))

LANE = 128
IN_PAD = 896                          # 784 padded to a multiple of 128 (decoder output side only)


def _round_up(n: int, m: int) -> int:
    return ((n + m - 1) // m) * m


def autoencoder_kernel(x_ref, w1_ref, b1_ref, wmid_ref, bmid_ref, w8_ref, b8_ref,
                       enc_ref, dec_ref):
    """One batch tile through all 8 layers. Weights bf16, accumulation/activations f32."""
    # layer 1: 784 -> 128, tanh
    h = jnp.dot(x_ref[...].astype(jnp.bfloat16), w1_ref[...],
                preferred_element_type=jnp.float32) + b1_ref[...]
    h = jnp.tanh(h)

    # layers 2..7 (all zero-padded to 128x128); layer 4 (j == 2) is the linear
    # bottleneck (no tanh) and is written to enc_ref. Padded weight/bias lanes
    # are exactly zero, so padded activation lanes stay zero (tanh(0) == 0).
    for j in range(6):
        h = jnp.dot(h.astype(jnp.bfloat16), wmid_ref[j],
                    preferred_element_type=jnp.float32) + bmid_ref[j]
        if j == 2:
            enc_ref[...] = h          # padded lanes are exactly 0
        else:
            h = jnp.tanh(h)

    # layer 8: 128 -> 784 (padded to 896), sigmoid
    h = jnp.dot(h.astype(jnp.bfloat16), w8_ref[...],
                preferred_element_type=jnp.float32) + b8_ref[...]
    dec_ref[...] = jax.nn.sigmoid(h)  # padded lanes hold 0.5; sliced off outside


def init_params(key):
    """Deterministic init matching PyTorch Linear's U(-1/sqrt(fan_in), ...) scheme."""
    params = []
    for (din, dout) in LAYER_DIMS:
        key, kw, kb = jax.random.split(key, 3)
        bound = 1.0 / float(din) ** 0.5
        W = jax.random.uniform(kw, (din, dout), jnp.float32, -bound, bound)
        b = jax.random.uniform(kb, (dout,), jnp.float32, -bound, bound)
        params.append((W, b))
    return params


def prepare_params(params):
    """One-time: pad to lane multiples, stack the 128x128 hidden layers, cast weights to bf16."""
    (W1, b1) = params[0]
    (W8, b8) = params[7]

    w1 = W1.astype(jnp.bfloat16)                                   # (784, 128) — no padding needed
    b1p = b1.reshape(1, -1)                                        # (1, 128)  f32

    w8 = jnp.pad(W8, ((0, 0), (0, IN_PAD - IN_DIM))).astype(jnp.bfloat16)   # (128, 896)
    b8p = jnp.pad(b8, (0, IN_PAD - IN_DIM)).reshape(1, -1)                  # (1, 896)  f32

    wm, bm = [], []
    for (W, b) in params[1:7]:
        din, dout = W.shape
        wm.append(jnp.pad(W, ((0, LANE - din), (0, LANE - dout))).astype(jnp.bfloat16))
        bm.append(jnp.pad(b, (0, LANE - dout)).reshape(1, -1))
    wmid = jnp.stack(wm)                                           # (6, 128, 128) bf16
    bmid = jnp.stack(bm)                                           # (6, 1, 128)   f32

    return dict(w1=w1, b1=b1p, wmid=wmid, bmid=bmid, w8=w8, b8=b8p)


def _cost_estimate(Bp):
    """Advisory FLOP / byte / transcendental counts for the whole call."""
    flops = 0
    for (din, dout) in LAYER_DIMS:
        flops += 2 * Bp * din * dout
    # tanh x6 layers + sigmoid (exp) on the 896-wide padded output
    transcendentals = Bp * (128 + 64 + 32 + 32 + 64 + 128 + IN_PAD)
    bytes_accessed = 4 * Bp * (IN_DIM + LANE + IN_PAD)             # x in, enc + dec out (f32)
    bytes_accessed += 2 * (IN_DIM * LANE + 6 * LANE * LANE + LANE * IN_PAD)  # bf16 weights
    return pl.CostEstimate(flops=flops, transcendentals=transcendentals,
                           bytes_accessed=bytes_accessed)


def autoencoder_forward(x, kparams, tb=256):
    """x: (B, 784) f32. Returns (encoded (B, 3), decoded (B, 784))."""
    B, D = x.shape
    assert D == IN_DIM
    assert tb % 8 == 0
    TB = min(tb, _round_up(B, 8))
    Bp = _round_up(B, TB)
    if Bp != B:
        x = jnp.pad(x, ((0, Bp - B), (0, 0)))   # batch rows only; padded rows are discarded

    const2 = lambda i: (0, 0)
    const3 = lambda i: (0, 0, 0)

    enc_p, dec_p = pl.pallas_call(
        autoencoder_kernel,
        out_shape=(
            jax.ShapeDtypeStruct((Bp, LANE), jnp.float32),
            jax.ShapeDtypeStruct((Bp, IN_PAD), jnp.float32),
        ),
        grid=(Bp // TB,),
        in_specs=[
            pl.BlockSpec((TB, IN_DIM), lambda i: (i, 0)),      # x: batch-tiled, full 784-lane extent
            pl.BlockSpec((IN_DIM, LANE), const2),              # w1 (resident)
            pl.BlockSpec((1, LANE), const2),                   # b1 (resident)
            pl.BlockSpec((6, LANE, LANE), const3),             # stacked hidden weights (resident)
            pl.BlockSpec((6, 1, LANE), const3),                # stacked hidden biases (resident)
            pl.BlockSpec((LANE, IN_PAD), const2),              # w8 (resident)
            pl.BlockSpec((1, IN_PAD), const2),                 # b8 (resident)
        ],
        out_specs=(
            pl.BlockSpec((TB, LANE), lambda i: (i, 0)),        # encoded (lane-dense, 128)
            pl.BlockSpec((TB, IN_PAD), lambda i: (i, 0)),      # decoded (lane-dense, 896)
        ),
        compiler_params=pltpu.CompilerParams(
            dimension_semantics=("parallel",),                 # v7x: shard batch across both TCs
        ),
        cost_estimate=_cost_estimate(Bp),
    )(x, kparams["w1"], kparams["b1"], kparams["wmid"], kparams["bmid"],
      kparams["w8"], kparams["b8"])

    encoded = enc_p[:B, :ENC_DIMS[-1]]
    decoded = dec_p[:B, :DEC_DIMS[-1]]
    return encoded, decoded


def autoencoder_ref(x, params):
    """Pure-JAX f32 reference for sanity checking."""
    h = x
    for i, (W, b) in enumerate(params[:4]):
        h = h @ W + b
        if i < 3:
            h = jnp.tanh(h)
    enc = h
    for i, (W, b) in enumerate(params[4:]):
        h = h @ W + b
        if i < 3:
            h = jnp.tanh(h)
    dec = jax.nn.sigmoid(h)
    return enc, dec


if __name__ == "__main__":
    key = jax.random.PRNGKey(0)
    k_params, k_x = jax.random.split(key)

    params = init_params(k_params)
    kernel_params = prepare_params(params)   # pad / stack / bf16-cast once, reused every call

    B = 16
    x = jax.random.uniform(k_x, (B, IN_DIM), jnp.float32)  # MNIST-like flattened input

    # tb=8 keeps the demo tiny while still exercising a 2-step batch grid;
    # real batches should use the default tb=256 (or ~1024 on v7x, larger on v5e/v6e).
    encoded, decoded = autoencoder_forward(x, kernel_params, tb=8)
    jax.block_until_ready((encoded, decoded))

    enc_ref, dec_ref = autoencoder_ref(x, params)
    assert encoded.shape == (B, 3) and decoded.shape == (B, IN_DIM)
    # bf16 MXU operands with f32 accumulation -> loosened tolerance vs f32 reference.
    assert jnp.allclose(encoded, enc_ref, atol=2e-2, rtol=2e-2)
    assert jnp.allclose(decoded, dec_ref, atol=2e-2, rtol=2e-2)

    print("KERNEL_OK")
</pallas_src>

<mosaic_0001>
module attributes {stable_mosaic.version = 11 : i64} {
  func.func @autoencoder_kernel(%arg0: i32, %arg1: memref<8x784xf32, #tpu.memory_space<vmem>>, %arg2: memref<784x128xbf16, #tpu.memory_space<vmem>>, %arg3: memref<1x128xf32, #tpu.memory_space<vmem>>, %arg4: memref<6x128x128xbf16, #tpu.memory_space<vmem>>, %arg5: memref<6x1x128xf32, #tpu.memory_space<vmem>>, %arg6: memref<128x896xbf16, #tpu.memory_space<vmem>>, %arg7: memref<1x896xf32, #tpu.memory_space<vmem>>, %arg8: memref<8x128xf32, #tpu.memory_space<vmem>>, %arg9: memref<8x896xf32, #tpu.memory_space<vmem>>) attributes {dimension_semantics = [#tpu.dimension_semantics<parallel>], iteration_bounds = array<i64: 2>, scalar_prefetch = 0 : i64, scratch_operands = 0 : i64, tpu.core_type = #tpu.core_type<tc>, window_params = [{transform_indices = @transform_0, window_bounds = array<i64: 8, 784>}, {pipeline_mode = #tpu.pipeline_mode<synchronous>, transform_indices = @transform_1, window_bounds = array<i64: 784, 128>}, {pipeline_mode = #tpu.pipeline_mode<synchronous>, transform_indices = @transform_2, window_bounds = array<i64: 1, 128>}, {pipeline_mode = #tpu.pipeline_mode<synchronous>, transform_indices = @transform_3, window_bounds = array<i64: 6, 128, 128>}, {pipeline_mode = #tpu.pipeline_mode<synchronous>, transform_indices = @transform_4, window_bounds = array<i64: 6, 1, 128>}, {pipeline_mode = #tpu.pipeline_mode<synchronous>, transform_indices = @transform_5, window_bounds = array<i64: 128, 896>}, {pipeline_mode = #tpu.pipeline_mode<synchronous>, transform_indices = @transform_6, window_bounds = array<i64: 1, 896>}, {transform_indices = @transform_7, window_bounds = array<i64: 8, 128>}, {transform_indices = @transform_8, window_bounds = array<i64: 8, 896>}]} {
    %c0 = arith.constant 0 : index
    %c0_0 = arith.constant 0 : index
    %0 = vector.load %arg1[%c0, %c0_0] : memref<8x784xf32, #tpu.memory_space<vmem>>, vector<8x784xf32>
    %1 = arith.truncf %0 : vector<8x784xf32> to vector<8x784xbf16>
    %c0_1 = arith.constant 0 : index
    %c0_2 = arith.constant 0 : index
    %2 = vector.load %arg2[%c0_1, %c0_2] : memref<784x128xbf16, #tpu.memory_space<vmem>>, vector<784x128xbf16>
    %cst = arith.constant dense<0.000000e+00> : vector<8x128xf32>
    %3 = tpu.matmul %1, %2, %cst {dimension_numbers = #tpu.dot_dimension_numbers<[1], [0], [0], [1], [0, 0, 1, 1], [], []>} : vector<8x784xbf16>, vector<784x128xbf16>, vector<8x128xf32> -> vector<8x128xf32>
    %c0_3 = arith.constant 0 : index
    %c0_4 = arith.constant 0 : index
    %4 = vector.load %arg3[%c0_3, %c0_4] : memref<1x128xf32, #tpu.memory_space<vmem>>, vector<1x128xf32>
    %5 = vector.broadcast %4 : vector<1x128xf32> to vector<8x128xf32>
    %6 = arith.addf %3, %5 : vector<8x128xf32>
    %7 = math.tanh %6 : vector<8x128xf32>
    %8 = arith.truncf %7 : vector<8x128xf32> to vector<8x128xbf16>
    %c0_5 = arith.constant 0 : index
    %c0_6 = arith.constant 0 : index
    %c0_7 = arith.constant 0 : index
    %9 = vector.load %arg4[%c0_5, %c0_6, %c0_7] : memref<6x128x128xbf16, #tpu.memory_space<vmem>>, vector<1x128x128xbf16>
    %10 = vector.shape_cast %9 : vector<1x128x128xbf16> to vector<128x128xbf16>
    %cst_8 = arith.constant dense<0.000000e+00> : vector<8x128xf32>
    %11 = tpu.matmul %8, %10, %cst_8 {dimension_numbers = #tpu.dot_dimension_numbers<[1], [0], [0], [1], [0, 0, 1, 1], [], []>} : vector<8x128xbf16>, vector<128x128xbf16>, vector<8x128xf32> -> vector<8x128xf32>
    %c0_9 = arith.constant 0 : index
    %c0_10 = arith.constant 0 : index
    %c0_11 = arith.constant 0 : index
    %12 = vector.load %arg5[%c0_9, %c0_10, %c0_11] : memref<6x1x128xf32, #tpu.memory_space<vmem>>, vector<1x1x128xf32>
    %13 = vector.shape_cast %12 : vector<1x1x128xf32> to vector<1x128xf32>
    %14 = vector.broadcast %13 : vector<1x128xf32> to vector<8x128xf32>
    %15 = arith.addf %11, %14 : vector<8x128xf32>
    %16 = math.tanh %15 : vector<8x128xf32>
    %17 = arith.truncf %16 : vector<8x128xf32> to vector<8x128xbf16>
    %c1 = arith.constant 1 : index
    %c0_12 = arith.constant 0 : index
    %c0_13 = arith.constant 0 : index
    %18 = vector.load %arg4[%c1, %c0_12, %c0_13] : memref<6x128x128xbf16, #tpu.memory_space<vmem>>, vector<1x128x128xbf16>
    %19 = vector.shape_cast %18 : vector<1x128x128xbf16> to vector<128x128xbf16>
    %cst_14 = arith.constant dense<0.000000e+00> : vector<8x128xf32>
    %20 = tpu.matmul %17, %19, %cst_14 {dimension_numbers = #tpu.dot_dimension_numbers<[1], [0], [0], [1], [0, 0, 1, 1], [], []>} : vector<8x128xbf16>, vector<128x128xbf16>, vector<8x128xf32> -> vector<8x128xf32>
    %c1_15 = arith.constant 1 : index
    %c0_16 = arith.constant 0 : index
    %c0_17 = arith.constant 0 : index
    %21 = vector.load %arg5[%c1_15, %c0_16, %c0_17] : memref<6x1x128xf32, #tpu.memory_space<vmem>>, vector<1x1x128xf32>
    %22 = vector.shape_cast %21 : vector<1x1x128xf32> to vector<1x128xf32>
    %23 = vector.broadcast %22 : vector<1x128xf32> to vector<8x128xf32>
    %24 = arith.addf %20, %23 : vector<8x128xf32>
    %25 = math.tanh %24 : vector<8x128xf32>
    %26 = arith.truncf %25 : vector<8x128xf32> to vector<8x128xbf16>
    %c2 = arith.constant 2 : index
    %c0_18 = arith.constant 0 : index
    %c0_19 = arith.constant 0 : index
    %27 = vector.load %arg4[%c2, %c0_18, %c0_19] : memref<6x128x128xbf16, #tpu.memory_space<vmem>>, vector<1x128x128xbf16>
    %28 = vector.shape_cast %27 : vector<1x128x128xbf16> to vector<128x128xbf16>
    %cst_20 = arith.constant dense<0.000000e+00> : vector<8x128xf32>
    %29 = tpu.matmul %26, %28, %cst_20 {dimension_numbers = #tpu.dot_dimension_numbers<[1], [0], [0], [1], [0, 0, 1, 1], [], []>} : vector<8x128xbf16>, vector<128x128xbf16>, vector<8x128xf32> -> vector<8x128xf32>
    %c2_21 = arith.constant 2 : index
    %c0_22 = arith.constant 0 : index
    %c0_23 = arith.constant 0 : index
    %30 = vector.load %arg5[%c2_21, %c0_22, %c0_23] : memref<6x1x128xf32, #tpu.memory_space<vmem>>, vector<1x1x128xf32>
    %31 = vector.shape_cast %30 : vector<1x1x128xf32> to vector<1x128xf32>
    %32 = vector.broadcast %31 : vector<1x128xf32> to vector<8x128xf32>
    %33 = arith.addf %29, %32 : vector<8x128xf32>
    %c0_24 = arith.constant 0 : index
    %c0_25 = arith.constant 0 : index
    %34 = vector.load %arg8[%c0_24, %c0_25] : memref<8x128xf32, #tpu.memory_space<vmem>>, vector<8x128xf32>
    tpu.vector_store %arg8[%c0_24, %c0_25], %33 {strides = array<i32>} : memref<8x128xf32, #tpu.memory_space<vmem>>, vector<8x128xf32>,
    %35 = arith.truncf %33 : vector<8x128xf32> to vector<8x128xbf16>
    %c3 = arith.constant 3 : index
    %c0_26 = arith.constant 0 : index
    %c0_27 = arith.constant 0 : index
    %36 = vector.load %arg4[%c3, %c0_26, %c0_27] : memref<6x128x128xbf16, #tpu.memory_space<vmem>>, vector<1x128x128xbf16>
    %37 = vector.shape_cast %36 : vector<1x128x128xbf16> to vector<128x128xbf16>
    %cst_28 = arith.constant dense<0.000000e+00> : vector<8x128xf32>
    %38 = tpu.matmul %35, %37, %cst_28 {dimension_numbers = #tpu.dot_dimension_numbers<[1], [0], [0], [1], [0, 0, 1, 1], [], []>} : vector<8x128xbf16>, vector<128x128xbf16>, vector<8x128xf32> -> vector<8x128xf32>
    %c3_29 = arith.constant 3 : index
    %c0_30 = arith.constant 0 : index
    %c0_31 = arith.constant 0 : index
    %39 = vector.load %arg5[%c3_29, %c0_30, %c0_31] : memref<6x1x128xf32, #tpu.memory_space<vmem>>, vector<1x1x128xf32>
    %40 = vector.shape_cast %39 : vector<1x1x128xf32> to vector<1x128xf32>
    %41 = vector.broadcast %40 : vector<1x128xf32> to vector<8x128xf32>
    %42 = arith.addf %38, %41 : vector<8x128xf32>
    %43 = math.tanh %42 : vector<8x128xf32>
    %44 = arith.truncf %43 : vector<8x128xf32> to vector<8x128xbf16>
    %c4 = arith.constant 4 : index
    %c0_32 = arith.constant 0 : index
    %c0_33 = arith.constant 0 : index
    %45 = vector.load %arg4[%c4, %c0_32, %c0_33] : memref<6x128x128xbf16, #tpu.memory_space<vmem>>, vector<1x128x128xbf16>
    %46 = vector.shape_cast %45 : vector<1x128x128xbf16> to vector<128x128xbf16>
    %cst_34 = arith.constant dense<0.000000e+00> : vector<8x128xf32>
    %47 = tpu.matmul %44, %46, %cst_34 {dimension_numbers = #tpu.dot_dimension_numbers<[1], [0], [0], [1], [0, 0, 1, 1], [], []>} : vector<8x128xbf16>, vector<128x128xbf16>, vector<8x128xf32> -> vector<8x128xf32>
    %c4_35 = arith.constant 4 : index
    %c0_36 = arith.constant 0 : index
    %c0_37 = arith.constant 0 : index
    %48 = vector.load %arg5[%c4_35, %c0_36, %c0_37] : memref<6x1x128xf32, #tpu.memory_space<vmem>>, vector<1x1x128xf32>
    %49 = vector.shape_cast %48 : vector<1x1x128xf32> to vector<1x128xf32>
    %50 = vector.broadcast %49 : vector<1x128xf32> to vector<8x128xf32>
    %51 = arith.addf %47, %50 : vector<8x128xf32>
    %52 = math.tanh %51 : vector<8x128xf32>
    %53 = arith.truncf %52 : vector<8x128xf32> to vector<8x128xbf16>
    %c5 = arith.constant 5 : index
    %c0_38 = arith.constant 0 : index
    %c0_39 = arith.constant 0 : index
    %54 = vector.load %arg4[%c5, %c0_38, %c0_39] : memref<6x128x128xbf16, #tpu.memory_space<vmem>>, vector<1x128x128xbf16>
    %55 = vector.shape_cast %54 : vector<1x128x128xbf16> to vector<128x128xbf16>
    %cst_40 = arith.constant dense<0.000000e+00> : vector<8x128xf32>
    %56 = tpu.matmul %53, %55, %cst_40 {dimension_numbers = #tpu.dot_dimension_numbers<[1], [0], [0], [1], [0, 0, 1, 1], [], []>} : vector<8x128xbf16>, vector<128x128xbf16>, vector<8x128xf32> -> vector<8x128xf32>
    %c5_41 = arith.constant 5 : index
    %c0_42 = arith.constant 0 : index
    %c0_43 = arith.constant 0 : index
    %57 = vector.load %arg5[%c5_41, %c0_42, %c0_43] : memref<6x1x128xf32, #tpu.memory_space<vmem>>, vector<1x1x128xf32>
    %58 = vector.shape_cast %57 : vector<1x1x128xf32> to vector<1x128xf32>
    %59 = vector.broadcast %58 : vector<1x128xf32> to vector<8x128xf32>
    %60 = arith.addf %56, %59 : vector<8x128xf32>
    %61 = math.tanh %60 : vector<8x128xf32>
    %62 = arith.truncf %61 : vector<8x128xf32> to vector<8x128xbf16>
    %c0_44 = arith.constant 0 : index
    %c0_45 = arith.constant 0 : index
    %63 = vector.load %arg6[%c0_44, %c0_45] : memref<128x896xbf16, #tpu.memory_space<vmem>>, vector<128x896xbf16>
    %cst_46 = arith.constant dense<0.000000e+00> : vector<8x896xf32>
    %64 = tpu.matmul %62, %63, %cst_46 {dimension_numbers = #tpu.dot_dimension_numbers<[1], [0], [0], [1], [0, 0, 1, 1], [], []>} : vector<8x128xbf16>, vector<128x896xbf16>, vector<8x896xf32> -> vector<8x896xf32>
    %c0_47 = arith.constant 0 : index
    %c0_48 = arith.constant 0 : index
    %65 = vector.load %arg7[%c0_47, %c0_48] : memref<1x896xf32, #tpu.memory_space<vmem>>, vector<1x896xf32>
    %66 = vector.broadcast %65 : vector<1x896xf32> to vector<8x896xf32>
    %67 = arith.addf %64, %66 : vector<8x896xf32>
    %68 = arith.negf %67 : vector<8x896xf32>
    %69 = math.exp %68 : vector<8x896xf32>
    %cst_49 = arith.constant 1.000000e+00 : f32
    %70 = vector.broadcast %cst_49 : f32 to vector<8x896xf32>
    %71 = arith.addf %70, %69 : vector<8x896xf32>
    %72 = arith.divf %70, %71 : vector<8x896xf32>
    %c0_50 = arith.constant 0 : index
    %c0_51 = arith.constant 0 : index
    %73 = vector.load %arg9[%c0_50, %c0_51] : memref<8x896xf32, #tpu.memory_space<vmem>>, vector<8x896xf32>
    tpu.vector_store %arg9[%c0_50, %c0_51], %72 {strides = array<i32>} : memref<8x896xf32, #tpu.memory_space<vmem>>, vector<8x896xf32>,
    return
  }
  func.func @transform_0(%arg0: i32) -> (i32, i32) {
    %c0_i32 = arith.constant 0 : i32
    %c0_i32_0 = arith.constant 0 : i32
    return %arg0, %c0_i32 : i32, i32
  }
  func.func @transform_1(%arg0: i32) -> (i32, i32) {
    %c0_i32 = arith.constant 0 : i32
    %c0_i32_0 = arith.constant 0 : i32
    %c0_i32_1 = arith.constant 0 : i32
    return %c0_i32, %c0_i32_0 : i32, i32
  }
  func.func @transform_2(%arg0: i32) -> (i32, i32) {
    %c0_i32 = arith.constant 0 : i32
    %c0_i32_0 = arith.constant 0 : i32
    %c0_i32_1 = arith.constant 0 : i32
    return %c0_i32, %c0_i32_0 : i32, i32
  }
  func.func @transform_3(%arg0: i32) -> (i32, i32, i32) {
    %c0_i32 = arith.constant 0 : i32
    %c0_i32_0 = arith.constant 0 : i32
    %c0_i32_1 = arith.constant 0 : i32
    %c0_i32_2 = arith.constant 0 : i32
    return %c0_i32, %c0_i32_0, %c0_i32_1 : i32, i32, i32
  }
  func.func @transform_4(%arg0: i32) -> (i32, i32, i32) {
    %c0_i32 = arith.constant 0 : i32
    %c0_i32_0 = arith.constant 0 : i32
    %c0_i32_1 = arith.constant 0 : i32
    %c0_i32_2 = arith.constant 0 : i32
    return %c0_i32, %c0_i32_0, %c0_i32_1 : i32, i32, i32
  }
  func.func @transform_5(%arg0: i32) -> (i32, i32) {
    %c0_i32 = arith.constant 0 : i32
    %c0_i32_0 = arith.constant 0 : i32
    %c0_i32_1 = arith.constant 0 : i32
    return %c0_i32, %c0_i32_0 : i32, i32
  }
  func.func @transform_6(%arg0: i32) -> (i32, i32) {
    %c0_i32 = arith.constant 0 : i32
    %c0_i32_0 = arith.constant 0 : i32
    %c0_i32_1 = arith.constant 0 : i32
    return %c0_i32, %c0_i32_0 : i32, i32
  }
  func.func @transform_7(%arg0: i32) -> (i32, i32) {
    %c0_i32 = arith.constant 0 : i32
    %c0_i32_0 = arith.constant 0 : i32
    return %arg0, %c0_i32 : i32, i32
  }
  func.func @transform_8(%arg0: i32) -> (i32, i32) {
    %c0_i32 = arith.constant 0 : i32
    %c0_i32_0 = arith.constant 0 : i32
    return %arg0, %c0_i32 : i32, i32
  }
}

</mosaic_0001>

<bundles_post_ra>
// kernel: tpu_custom_call.1
= control target key start
LH: loop header
LB: loop body
LE: loop exit
PB: predicated region body
PF: predicated region fallthrough
CT: control target
= control target key end

     0   :  { %s3845_s0 = inlined_call_operand.hbm [shape: f32[16,784], index: 0, kind: input, shape index: {}]   ;;  %s3846_s1 = inlined_call_operand.hbm [shape: bf16[784,128], index: 1, kind: input, shape index: {}]   ;;  %s3847_s2 = inlined_call_operand.vmem [shape: f32[1,128], index: 2, kind: input, shape index: {}]   ;;  %s3848_s3 = inlined_call_operand.hbm [shape: bf16[6,128,128], index: 3, kind: input, shape index: {}]   ;;  %s3849_s4 = inlined_call_operand.hbm [shape: f32[6,1,128], index: 4, kind: input, shape index: {}]   ;;  %s3850_s5 = inlined_call_operand.hbm [shape: bf16[128,896], index: 5, kind: input, shape index: {}]   ;;  %s3851_s6 = inlined_call_operand.vmem [shape: f32[1,896], index: 6, kind: input, shape index: {}]   ;;  %s3852_s7 = inlined_call_operand.hbm [shape: f32[16,128], index: 7, kind: output, shape index: {0}]   ;;  %s3853_s8 = inlined_call_operand.hbm [shape: f32[16,896], index: 8, kind: output, shape index: {1}]  }
   0x1   :  { %3858 = sst [smem:[#allocation19_spill]] %s3846_s1 }
   0x2   :  { %3859 = sst [smem:[#allocation20_spill]] %s3848_s3 }
   0x3   :  { %3860 = sst [smem:[#allocation21_spill]] %s3849_s4 }
   0x4   :  { %14 = vsyncpa [#allocation3], 0 }
   0x5   :  { %16 = vsyncpa [#allocation3 + $0x1], 0 }
   0x6   :  { %17 = vsyncpa [#allocation6], 0 }
   0x7   :  { %18 = vsyncpa [#allocation9], 0 }
   0x8   :  { %19 = vsyncpa [#allocation4], 0 }
   0x9   :  { %21 = vsyncpa [#allocation4 + $0x1], 0 }
   0xa   :  { %22 = vsyncpa [#allocation13], 0 }
   0xb   :  { %24 = vsyncpa [#allocation13 + $0x1], 0  ;;  %s3516_s27 = smov 0   ;;  %s3518_s28 = smov 0  }
   0xc   :  { %s3520_s29 = smov 0   ;;  %s3522_s30 = smov 0  }
   0xd LB: > { %s3455_s9 = smov [#allocation5]   ;;  %s3537_s11 = sadd.s32 4294967295, %s3453_s30   ;;  %s3453_s30 = sphi %s3522_s30, %s3882_s30   ;;  %s3449_s29 = sphi %s3520_s29, %s3881_s29   ;;  %s3445_s28 = sphi %s3518_s28, %s3880_s28   ;;  %s3441_s27 = sphi %s3516_s27, %s3879_s27  }
   0xe   : > { %s251_s10 = sshll.u32 %s3455_s9, 4  ;;  %p2434_p0 = scmp.ge.s32.totalorder %s3453_s30, 1  ;;  %s252_s10 = int_to_ptr.vmem [resolvable:$true] %s251_s10 }
   0xf   : > { %p3854_p1 = scmp.eq.s32.totalorder %s3537_s11, 0  ;;  %p239_p2 = scmp.lt.s32.totalorder %s3453_s30, 3 }
  0x10   : > { %s3456_s13 = smov [#allocation8]   ;;  %s3457_s16 = smov [#allocation7]  }
  0x11   : > { %p3542_p3 = pnand %p2434_p0, %p239_p2  ;;  %s280_s14 = sshll.u32 %s3456_s13, 4  ;;  %s3555_s14 = int_to_ptr.vmem [resolvable:$true] %s280_s14 }
  0x12   : > { %s3557_s17 = sshll.u32 %s3457_s16, 4  ;;  %s3230_s18 = scalar_lea.vmem %s252_s10, 6272  ;;  %s268_s17 = int_to_ptr.vmem [resolvable:$true] %s3557_s17 }
  0x13   : > { %s3861_s12 = scalar_select %p3542_p3, 1, 0 }
  0x14   : > { %p2923_p5 = pneg %p3542_p3  ;;  %p3231_p8 = scmp.ne.s32.totalorder %s252_s10, %s3230_s18 }
  0x15   : > { %p3238_p11 = scmp.lt.s32.totalorder %s252_s10, %s252_s10  ;;  %p3239_p12 = scmp.lt.s32.totalorder %s3230_s18, %s3230_s18 }
  0x16   : > { %p3551_p6 = pnand %p2923_p5, %p3854_p1 }
  0x17   : > { %p3240_p13 = por %p3239_p12, %p3238_p11 }
  0x18   : > { %p3221_p7 = pneg %p3551_p6 }
  0x1a   : > { %p3233_p9 = pnand %p3231_p8, %p3221_p7 }
  0x1c   : > { %p3234_p10 = pneg %p3233_p9 }
  0x1e   : > { %p3241_p0 = pnand %p3240_p13, %p3234_p10 }
  0x20   : > { %3244 = shalt.err (!%p3241_p0)
}
  0x21   : > { %s3458_s19 = smov 64   ;;  %s3459_s20 = smov 4  }
  0x22   : > { %s3863_s1 = sld [smem:[#allocation19_spill]]  ;;  %s3256_s23 = scalar_lea.vmem %s3555_s14, 96 }
  0x23   : > { %p3257_p2 = scmp.ne.s32.totalorder %s3555_s14, %s3256_s23  ;;  %p3264_p9 = scmp.lt.s32.totalorder %s3555_s14, %s3555_s14 }
  0x24   : > { %p3265_p10 = scmp.lt.s32.totalorder %s3256_s23, %s3256_s23 }
  0x25   : > { %p3259_p5 = pnand %p3257_p2, %p3221_p7 }
  0x26   : > { %p3266_p11 = por %p3265_p10, %p3264_p9 }
  0x27   : > { %p3260_p8 = pneg %p3259_p5 }
  0x28   : > { %2926 = dma.hbm_to_vmem [thread:$0]  (!%p3551_p6), %s3863_s1, 6272, %s252_s10, [#allocation6], %s3458_s19, %s3458_s19, %s3459_s20  }
  0x29   : > { %p3267_p12 = pnand %p3266_p11, %p3260_p8 }
  0x2b   : > { %3270 = shalt.err (!%p3267_p12)
}
  0x2c   : > { %s3460_s24 = smov 16   ;;  %s3461_s25 = smov 1  }
  0x2d   : > { %s3864_s4 = sld [smem:[#allocation21_spill]]  ;;  %s3282_s10 = scalar_lea.vmem %s268_s17, 6144 }
  0x2e   : > { %p3283_p13 = scmp.ne.s32.totalorder %s268_s17, %s3282_s10  ;;  %p3290_p5 = scmp.lt.s32.totalorder %s268_s17, %s268_s17 }
  0x2f   : > { %p3291_p8 = scmp.lt.s32.totalorder %s3282_s10, %s3282_s10 }
  0x30   : > { %p3285_p0 = pnand %p3283_p13, %p3221_p7 }
  0x31   : > { %p3292_p9 = por %p3291_p8, %p3290_p5 }
  0x32   : > { %p3286_p2 = pneg %p3285_p0 }
  0x33   : > { %2932 = dma.hbm_to_vmem [thread:$0]  (!%p3551_p6), %s3864_s4, 96, %s3555_s14, [#allocation9], %s3460_s24, %s3460_s24, %s3461_s25  }
  0x34   : > { %p3293_p10 = pnand %p3292_p9, %p3286_p2 }
  0x36   : > { %3296 = shalt.err (!%p3293_p10)
}
  0x37   : > { %s3865_s3 = sld [smem:[#allocation20_spill]]  ;;  %s3462_s14 = smov [#allocation10]  }
  0x38   : > { %s293_s18 = sshll.u32 %s3462_s14, 4  ;;  %s294_s18 = int_to_ptr.vmem [resolvable:$true] %s293_s18 }
  0x39   : > { %s3308_s21 = scalar_lea.vmem %s294_s18, 7168  ;;  %p3316_p0 = scmp.lt.s32.totalorder %s294_s18, %s294_s18 }
  0x3a   : > { %p3309_p11 = scmp.ne.s32.totalorder %s294_s18, %s3308_s21  ;;  %p3317_p5 = scmp.lt.s32.totalorder %s3308_s21, %s3308_s21 }
  0x3c   : > { %p3311_p12 = pnand %p3309_p11, %p3221_p7  ;;  %p3318_p2 = por %p3317_p5, %p3316_p0 }
  0x3d   : > { %2929 = dma.hbm_to_vmem [thread:$0]  (!%p3551_p6), %s3865_s3, 6144, %s268_s17, [#allocation6], %s3458_s19, %s3458_s19, %s3459_s20  }
  0x3e   : > { %p3312_p13 = pneg %p3311_p12 }
  0x40   : > { %p3319_p8 = pnand %p3318_p2, %p3312_p13 }
  0x42   : > { %3322 = shalt.err (!%p3319_p8)
}
  0x43   : > { %s3463_s22 = smov 448   ;;  %s3464_s17 = smov 28  }
  0x44   : > { %2935 = dma.hbm_to_vmem [thread:$0]  (!%p3551_p6), %s3850_s5, 7168, %s294_s18, [#allocation9], %s3463_s22, %s3463_s22, %s3464_s17  }
  0x45   : > { %s2433_s23 = sadd.s32 4294967294, %s3453_s30   ;;  %s3601_s24 = sadd.s32 1, %s3453_s30  }
  0x46   : > { %s34_s25 = ssub.s32 %s3453_s30, %s3601_s24  ;;  %s37_s26 = sadd.s32 1, %s3449_s29 }
  0x47   : > { %p35_p7 = scmp.eq.s32.totalorder %s34_s25, 0  ;;  %p44_p9 = scmp.ne.s32.totalorder %s3449_s29, %s3445_s28 }
  0x48   : > { %p45_p10 = scmp.eq.s32.totalorder %s3453_s30, 0  ;;  %p50_p11 = scmp.ne.s32.totalorder %s3445_s28, %s3441_s27 }
  0x49   : > { %s3612_s9 = scalar_select %p35_p7, %s3449_s29, %s37_s26  }
  0x4a   : > { %p46_p12 = por %p45_p10, %p44_p9  ;;  %p3616_p13 = por %p3854_p1, %p50_p11 }
  0x4b   : > { %p200_p6 = scmp.eq.s32.totalorder %s3537_s11, 1  ;;  %p206_p0 = scmp.eq.s32.totalorder %s2433_s23, 1 }
  0x4c   : > { %s3866_s15 = scalar_select %p3616_p13, 1, 0 }
  0x4d   : > { %p2951_p5 = scmp.lt.s32.totalorder %s3453_s30, 2  ;;  %s310_s10 = sand.u32 1, %s3449_s29  }
  0x4e   : > { %p3623_p2 = por %p200_p6, %p44_p9  ;;  %p3627_p8 = por %p206_p0, %p50_p11 }
  0x4f   : > { %s2897_s14 = smul.u32 56, %s310_s10  ;;  %p3632_p7 = pnand %p2951_p5, %p46_p12 }
  0x50   : > { %s3867_s13 = scalar_select %p3623_p2, 1, 0 }
  0x51   : > { %s3868_s16 = scalar_select %p3627_p8, 1, 0 }
  0x52   : > { %s2898_s18 = smul.u32 896, %s3453_s30  ;;  %s314_s20 = scalar_lea.vmem [#allocation2], %s2897_s14 }
  0x53   : > { %s322_s23 = sshll.u32 %s314_s20, 4  ;;  %s311_s25 = scalar_lea.sflag [#allocation3], %s310_s10  ;;  %s323_s23 = int_to_ptr.vmem [resolvable:$true] %s322_s23 }
  0x54   : > { %s3639_s19 = scalar_lea.hbm %s3845_s0, %s2898_s18  ;;  %p3325_p10 = pneg %p3632_p7 }
  0x55   : > { %s3323_s26 = scalar_lea.hbm %s3639_s19, 896  ;;  %s3328_s22 = scalar_lea.hbm %s3845_s0, 1792 }
  0x56   : > { %p3324_p9 = scmp.ne.s32.totalorder %s3639_s19, %s3323_s26  ;;  %p3329_p6 = scmp.lt.s32.totalorder %s3639_s19, %s3845_s0 }
  0x57   : > { %p3330_p0 = scmp.lt.s32.totalorder %s3328_s22, %s3323_s26 }
  0x58   : > { %p3326_p11 = pnand %p3325_p10, %p3324_p9 }
  0x59   : > { %p3331_p5 = por %p3330_p0, %p3329_p6 }
  0x5a   : > { %p3327_p12 = pneg %p3326_p11 }
  0x5c   : > { %p3332_p4 = pnand %p3331_p5, %p3327_p12 }
  0x5e   : > { %3335 = shalt.err (!%p3332_p4)
}
  0x5f   : > { %s3336_s14 = scalar_lea.vmem %s323_s23, 896  ;;  %s3465_s10 = smov [#allocation2]  }
  0x60   : > { %p3337_p1 = scmp.ne.s32.totalorder %s323_s23, %s3336_s14  ;;  %s3341_s20 = sshll.u32 %s3465_s10, 4  ;;  %s3342_s20 = int_to_ptr.vmem [resolvable:$false] %s3341_s20 }
  0x61   : > { %s3343_s4 = scalar_lea.vmem %s3342_s20, 1792  ;;  %p3344_p9 = scmp.lt.s32.totalorder %s323_s23, %s3342_s20 }
  0x62   : > { %p3339_p8 = pnand %p3337_p1, %p3325_p10  ;;  %p3345_p11 = scmp.lt.s32.totalorder %s3343_s4, %s3336_s14 }
  0x64   : > { %p3340_p2 = pneg %p3339_p8  ;;  %p3346_p13 = por %p3345_p11, %p3344_p9 }
  0x66   : > { %p3347_p3 = pnand %p3346_p13, %p3340_p2 }
  0x68   : > { %3350 = shalt.err (!%p3347_p3)
}
  0x69   : > { %2939 = dma.hbm_to_vmem [thread:$0]  (!%p3632_p7), %s3639_s19, 896, %s323_s23, %s311_s25  }
  0x6a   : > { %p3870_p12 = scmp.ne.s32.totalorder %s3861_s12, 0 }
  0x6b   : > { %s3658_s1 = sand.u32 (!%p3870_p12), 1, %s3445_s28   ;;  %p3871_p1 = scmp.ne.s32.totalorder (!%p3870_p12), %s3866_s15, 0 }
  0x6c   : > { %331 = sbr.rel (%p3870_p12) target bundleno = 1928 (0x788), region = 48  ;;  %s334_s26 = scalar_lea.sflag (!%p3870_p12), [#allocation3], %s3658_s1 }
  0x6d   : > { %s2899_s3 = smul.u32 (!%p3870_p12), 56, %s3658_s1 }
  0x6f   : > { %s3664_s4 = scalar_lea.vmem (!%p3870_p12), [#allocation2], %s2899_s3 }
  0x71   : > { %3420 = dma.done.wait (%p3871_p1), %s334_s26, 896  }
  0x72   : > { %3422 = vsyncadd (%p3871_p1), %s334_s26, 4294966400  ;;  %p3872_p3 = scmp.eq.s32.totalorder %s3537_s11, 0 }
  0x74   : > { %3424 = dma.done.wait (%p3872_p3), [#allocation6], 12416   ;;  %p3873_p4 = pmov %p3872_p3 }
  0x75   : > { %p3874_p13 = pmov %p3872_p3 }
  0x76   : > { %3426 = vsyncadd (%p3873_p4), [#allocation6], 4294954880 }
  0x77   : > { %3428 = dma.done.wait (%p3874_p13), [#allocation9], 7264   ;;  %p3875_p2 = pmov %p3872_p3 }
  0x78   : > { %v3002_v0 = vld [vmem:[#allocation5 + $0x78] sm:$0xff]   ;;  %v3006_v4 = vld [vmem:[#allocation5 + $0x70] sm:$0xff]   ;;  %v3010_v8 = vld [vmem:[#allocation5 + $0x68] sm:$0xff]   ;;  %v3466_v44 = vmov 0.0   ;;  %vm3467_vm0 = vmmov 0   ;;  %vm805_vm1 = vcmask 130048  }
  0x79   : > { %3430 = vsyncadd (%p3875_p2), [#allocation9], 4294960032  ;;  %v3003_v1 = vld [vmem:[#allocation5 + $0x38] sm:$0xff]   ;;  %2620 = vmatprep.subr.bf16.mxu0 %v3002_v0  ;;  %v3007_v5 = vld [vmem:[#allocation5 + $0x30] sm:$0xff]   ;;  %s2446_s21 = sshll.u32 %s3658_s1, 3  ;;  %s2616_s23 = sshll.u32 %s3537_s11, 7 }
  0x7a   : > { %v3004_v2 = vld [vmem:[#allocation5 + $0xf8] sm:$0xff]   ;;  %2621 = vmatpush3.bf16.msra.mxu0 %v3003_v1  ;;  %v3008_v6 = vld [vmem:[#allocation5 + $0xf0] sm:$0xff]   ;;  %v3011_v9 = vld [vmem:[#allocation5 + $0x28] sm:$0xff]   ;;  %s3739_s19 = scalar_lea.vmem [#allocation11], %s2446_s21  ;;  %s2277_s17 = scalar_lea.hbm %s3852_s7, %s2616_s23 }
  0x7b   : > { %v3005_v3 = vld [vmem:[#allocation5 + $0xb8] sm:$0xff]   ;;  %2642 = vmatprep.subr.bf16.mxu1 %v3004_v2  ;;  %2622 = vmatprep.subr.bf16.mxu0 %v3006_v4  ;;  %v3009_v7 = vld [vmem:[#allocation5 + $0xb0] sm:$0xff]   ;;  %v3012_v10 = vld [vmem:[#allocation5 + $0xe8] sm:$0xff]   ;;  %s2279_s18 = sshll.u32 %s3739_s19, 4  ;;  %s2261_s14 = scalar_lea.sflag [#allocation4], %s3658_s1  ;;  %s2280_s18 = int_to_ptr.vmem [resolvable:$true] %s2279_s18 }
  0x7c   : > { %2643 = vmatpush3.bf16.msra.mxu1 %v3005_v3  ;;  %v3013_v11 = vld [vmem:[#allocation5 + $0xa8] sm:$0xff]   ;;  %v3014_v12 = vld [vmem:[#allocation5 + $0x60] sm:$0xff]   ;;  %v3018_v16 = vld [vmem:[#allocation5 + $0x58] sm:$0xff]   ;;  %s3351_s10 = scalar_lea.vmem %s2280_s18, 128  ;;  %p3876_p7 = scmp.ne.s32.totalorder %s3867_s13, 0 }
  0x7d   : > { %2644 = vmatprep.subr.bf16.mxu1 %v3008_v6  ;;  %v3015_v13 = vld [vmem:[#allocation5 + $0x20] sm:$0xff]   ;;  %v3019_v17 = vld [vmem:[#allocation5 + $0x18] sm:$0xff]   ;;  %v3022_v20 = vld [vmem:[#allocation5 + $0x50] sm:$0xff]   ;;  %p3352_p8 = scmp.ne.s32.totalorder %s2280_s18, %s3351_s10  ;;  %s3469_s20 = smov [#allocation11]  }
  0x7e   : > { %2623 = vmatpush3.bf16.msra.mxu0 %v3007_v5  ;;  %v3016_v14 = vld [vmem:[#allocation5 + $0xe0] sm:$0xff]   ;;  %v3020_v18 = vld [vmem:[#allocation5 + $0xd8] sm:$0xff]   ;;  %v3023_v21 = vld [vmem:[#allocation5 + $0x10] sm:$0xff]   ;;  %s3355_s26 = sshll.u32 %s3469_s20, 4  ;;  %s3356_s26 = int_to_ptr.vmem [resolvable:$false] %s3355_s26 }
  0x7f   : > { %2624 = vmatprep.subr.bf16.mxu0 %v3010_v8  ;;  %v3017_v15 = vld [vmem:[#allocation5 + $0xa0] sm:$0xff]   ;;  %v3021_v19 = vld [vmem:[#allocation5 + $0x98] sm:$0xff]   ;;  %v3024_v22 = vld [vmem:[#allocation5 + $0xd0] sm:$0xff]   ;;  %p3353_p10 = pnand %p3352_p8, %p3876_p7  ;;  %p3358_p0 = scmp.lt.s32.totalorder %s2280_s18, %s3356_s26 }
  0x80   : > { %2645 = vmatpush3.bf16.msra.mxu1 %v3009_v7  ;;  %v3025_v23 = vld [vmem:[#allocation5 + $0x90] sm:$0xff]   ;;  %v3026_v24 = vld [vmem:[#allocation5 + $0x48] sm:$0xff]   ;;  %v3030_v28 = vld [vmem:[#allocation5 + $0x40] sm:$0xff]  }
  0x81   : > { %2646 = vmatprep.subr.bf16.mxu1 %v3012_v10  ;;  %v3027_v25 = vld [vmem:[#allocation5 + $0x8] sm:$0xff]   ;;  %v3031_v29 = vld [vmem:[#allocation5] sm:$0xff]   ;;  %v393_v31 = vld [vmem:[%s3664_s4 + $0x8] sm:$0xff]  ;;  %p3354_p6 = pneg %p3353_p10 }
  0x82   : > { %2625 = vmatpush3.bf16.msra.mxu0 %v3011_v9  ;;  %v3028_v26 = vld [vmem:[#allocation5 + $0xc8] sm:$0xff]   ;;  %v3032_v30 = vld [vmem:[#allocation5 + $0xc0] sm:$0xff]   ;;  %v400_v32 = vpack.c.bf16 %v393_v31, %v393_v31  ;;  %v3034_v36 = vld [vmem:[#allocation5 + $0x178] sm:$0xff]  }
  0x83   : > { %2626 = vmatprep.subr.bf16.mxu0 %v3014_v12  ;;  %v3029_v27 = vld [vmem:[#allocation5 + $0x88] sm:$0xff]   ;;  %v3033_v33 = vld [vmem:[#allocation5 + $0x80] sm:$0xff]   ;;  %v3035_v39 = vld [vmem:[#allocation5 + $0x138] sm:$0xff]  }
  0x84   : > { %2647 = vmatpush3.bf16.msra.mxu1 %v3013_v11  ;;  %v392_v34 = vld [vmem:[%s3664_s4] sm:$0xff]  ;;  %v395_v37 = vld [vmem:[%s3664_s4 + $0x18] sm:$0xff]  ;;  %841 = vmatprep.mubr.bf16.mxu0 %v400_v32  ;;  %v394_v40 = vld [vmem:[%s3664_s4 + $0x10] sm:$0xff] }
  0x85   : > { %2648 = vmatprep.subr.bf16.mxu1 %v3016_v14  ;;  %v399_v35 = vpack.c.bf16 %v392_v34, %v392_v34  ;;  %v402_v38 = vpack.c.bf16 %v395_v37, %v395_v37  ;;  %v401_v41 = vpack.c.bf16 %v394_v40, %v394_v40  ;;  %v3036_v42 = vld [vmem:[#allocation5 + $0x170] sm:$0xff]   ;;  %v3038_v45 = vld [vmem:[#allocation5 + $0x168] sm:$0xff]   ;;  %v3040_v47 = vld [vmem:[#allocation5 + $0x160] sm:$0xff]  }
  0x86   : > { %2627 = vmatpush3.bf16.msra.mxu0 %v3015_v13  ;;  %v3037_v43 = vld [vmem:[#allocation5 + $0x130] sm:$0xff]   ;;  %v3039_v46 = vld [vmem:[#allocation5 + $0x128] sm:$0xff]   ;;  %v3041_v48 = vld [vmem:[#allocation5 + $0x120] sm:$0xff]  }
  0x87   : > { %2628 = vmatprep.subr.bf16.mxu0 %v3018_v16  ;;  %881 = vmatprep.mubr.bf16.mxu1 %v402_v38  ;;  %v3042_v49 = vld [vmem:[#allocation5 + $0x158] sm:$0xff]   ;;  %v3044_v51 = vld [vmem:[#allocation5 + $0x150] sm:$0xff]   ;;  %v3050_v53 = vld [vmem:[#allocation5 + $0x180] sm:$0xff]  }
  0x88   : > { %2649 = vmatpush3.bf16.msra.mxu1 %v3017_v15  ;;  %v3043_v50 = vld [vmem:[#allocation5 + $0x118] sm:$0xff]   ;;  %v3045_v52 = vld [vmem:[#allocation5 + $0x110] sm:$0xff]   ;;  %v3046_v55 = vld [vmem:[#allocation5 + $0x148] sm:$0xff]  }
  0x89   : > { %2650 = vmatprep.subr.bf16.mxu1 %v3020_v18  ;;  %v397_v54 = vld [vmem:[%s3664_s4 + $0x28] sm:$0xff]  ;;  %v398_v57 = vld [vmem:[%s3664_s4 + $0x30] sm:$0xff]  ;;  %v3047_v59 = vld [vmem:[#allocation5 + $0x108] sm:$0xff]  }
  0x8a   : > { %2629 = vmatpush3.bf16.msra.mxu0 %v3019_v17  ;;  %v404_v56 = vpack.c.bf16 %v397_v54, %v397_v54  ;;  %v405_v58 = vpack.c.bf16 %v398_v57, %v398_v57  ;;  %v3048_v60 = vld [vmem:[#allocation5 + $0x140] sm:$0xff]   ;;  %v396_v62 = vld [vmem:[%s3664_s4 + $0x20] sm:$0xff]  ;;  %v3052_v1 = vld [vmem:[#allocation7 + $0x30] sm:$0xff]   ;;  %s3357_s4 = scalar_lea.vmem %s3356_s26, 256 }
  0x8b   : > { %2630 = vmatprep.subr.bf16.mxu0 %v3022_v20  ;;  %v3049_v61 = vld [vmem:[#allocation5 + $0x100] sm:$0xff]   ;;  %v403_v63 = vpack.c.bf16 %v396_v62, %v396_v62  ;;  %v3053_v2 = vld [vmem:[#allocation7 + $0x28] sm:$0xff]   ;;  %v3054_v3 = vld [vmem:[#allocation7 + $0x20] sm:$0xff]   ;;  %p3359_p5 = scmp.lt.s32.totalorder %s3357_s4, %s3351_s10 }
  0x8c   : > { %2651 = vmatpush3.bf16.msra.mxu1 %v3021_v19  ;;  %v3051_v0 = vld [vmem:[#allocation7 + $0x38] sm:$0xff]   ;;  %v3056_v5 = vld [vmem:[#allocation7 + $0x10] sm:$0xff]   ;;  %v3057_v6 = vld [vmem:[#allocation7 + $0x8] sm:$0xff]  }
  0x8d   : > { %2652 = vmatprep.subr.bf16.mxu1 %v3024_v22  ;;  %v3055_v4 = vld [vmem:[#allocation7 + $0x18] sm:$0xff]   ;;  %v3058_v7 = vld [vmem:[#allocation7] sm:$0xff]   ;;  %v3060_v9 = vld [vmem:[#allocation7 + $0x70] sm:$0xff]   ;;  %p3360_p9 = por %p3359_p5, %p3358_p0 }
  0x8e   : > { %2631 = vmatpush3.bf16.msra.mxu0 %v3023_v21  ;;  %v3059_v8 = vld [vmem:[#allocation7 + $0x78] sm:$0xff]   ;;  %v3061_v10 = vld [vmem:[#allocation7 + $0x68] sm:$0xff]   ;;  %v3062_v37 = vld [vmem:[#allocation7 + $0x60] sm:$0xff]  }
  0x8f   : > { %2632 = vmatprep.subr.bf16.mxu0 %v3026_v24  ;;  %v2447_v24 = vld [vmem:[%s3847_s2] ss:$0 sm:$0xff]  ;;  %v3063_v38 = vld [vmem:[#allocation7 + $0x58] sm:$0xff]   ;;  %v3070_v54 = vld [vmem:[#allocation7 + $0xa0] sm:$0xff]   ;;  %p3361_p11 = pnand %p3360_p9, %p3354_p6 }
  0x90   : > { %2653 = vmatpush3.bf16.msra.mxu1 %v3025_v23  ;;  %v3065_v40 = vld [vmem:[#allocation7 + $0x48] sm:$0xff]   ;;  %v3078_v62 = vld [vmem:[#allocation7 + $0xe0] sm:$0xff]  }
  0x91   : > { %2654 = vmatprep.subr.bf16.mxu1 %v3028_v26  ;;  %v3073_v57 = vld [vmem:[#allocation7 + $0x88] sm:$0xff]  }
  0x92   : > { %2633 = vmatpush3.bf16.msra.mxu0 %v3027_v25 }
  0x93   : > { %2634 = vmatprep.subr.bf16.mxu0 %v3030_v28 }
  0x94   : > { %2655 = vmatpush3.bf16.msra.mxu1 %v3029_v27 }
  0x95   : > { %2656 = vmatprep.subr.bf16.mxu1 %v3032_v30 }
  0x96   : > { %2635 = vmatpush3.bf16.msra.mxu0 %v3031_v29 }
  0x97   : > { %2664 = vmatprep.subr.bf16.mxu0 %v3034_v36 }
  0x98   : > { %2657 = vmatpush3.bf16.msra.mxu1 %v3033_v33 }
  0x99   : > { %842 = vmatmul.mubr.bf16.vlgmr.msra.gmra.mxu0 %v399_v35  ;;  %2751 = vmatprep.subr.bf16.mxu1 %v3466_v44 }
  0x9a   : > { %2665 = vmatpush3.bf16.msra.mxu0 %v3035_v39  ;;  %921 = vmatprep.mubr.bf16.mxu0 %v404_v56  ;;  %v3064_v39 = vld [vmem:[#allocation7 + $0x50] sm:$0xff]  }
  0x9b   : > { %882 = vmatmul.mubr.bf16.vlgmr.msra.gmra.mxu1 %v401_v41  ;;  %2666 = vmatprep.subr.bf16.mxu0 %v3036_v42  ;;  %v3066_v41 = vld [vmem:[#allocation7 + $0x40] sm:$0xff]   ;;  %v3067_v42 = vld [vmem:[#allocation7 + $0xb8] sm:$0xff]   ;;  %v3072_v56 = vld [vmem:[#allocation7 + $0x90] sm:$0xff]  }
  0x9c   : > { %2753 = vmatprep.mubr.msk.bf16.mxu1 %vm3467_vm0, %v3466_v44  ;;  %2752 = vmatpush3.bf16.msra.mxu1 %v3050_v53 }
  0x9d   : > { %2757 = vmatprep.subr.bf16.mxu1 %v3466_v44 }
  0x9e   : > { %2667 = vmatpush3.bf16.msra.mxu0 %v3037_v43  ;;  %v3068_v43 = vld [vmem:[#allocation7 + $0xb0] sm:$0xff]  }
  0x9f   : > { %2668 = vmatprep.subr.bf16.mxu0 %v3038_v45  ;;  %v3069_v45 = vld [vmem:[#allocation7 + $0xa8] sm:$0xff]  }
  0xa2   : > { %2669 = vmatpush3.bf16.msra.mxu0 %v3039_v46  ;;  %v2498_v46 = vld [vmem:[#allocation8] ss:$0 sm:$0xff] }
  0xa3   : > { %2670 = vmatprep.subr.bf16.mxu0 %v3040_v47  ;;  %2754 = vmatmul.mubr.msk.bf16.vlgmr.msra.gmra.mxu1 %vm805_vm1, %v405_v58  ;;  %v3074_v58 = vld [vmem:[#allocation7 + $0x80] sm:$0xff]  }
  0xa4   : > { %2773 = vmatprep.mubr.msk.bf16.mxu1 %vm3467_vm0, %v3466_v44  ;;  %2758 = vmatpush3.bf16.msra.mxu1 %v3051_v0  ;;  %v3080_v0 = vld [vmem:[#allocation7 + $0xd0] sm:$0xff]  }
  0xa5   : > { %2759 = vmatprep.subr.bf16.mxu1 %v3466_v44 }
  0xa6   : > { %2671 = vmatpush3.bf16.msra.mxu0 %v3041_v48 }
  0xa7   : > { %2672 = vmatprep.subr.bf16.mxu0 %v3042_v49 }
  0xa8   : > { %2760 = vmatpush3.bf16.msra.mxu1 %v3052_v1  ;;  %v3081_v1 = vld [vmem:[#allocation7 + $0xc8] sm:$0xff]  }
  0xa9   : > { %2761 = vmatprep.subr.bf16.mxu1 %v3466_v44 }
  0xaa   : > { %2673 = vmatpush3.bf16.msra.mxu0 %v3043_v50 }
  0xab   : > { %2674 = vmatprep.subr.bf16.mxu0 %v3044_v51 }
  0xac   : > { %2762 = vmatpush3.bf16.msra.mxu1 %v3053_v2  ;;  %v2507_v2 = vld [vmem:[#allocation8 + $0x1] ss:$0 sm:$0xff] }
  0xad   : > { %2763 = vmatprep.subr.bf16.mxu1 %v3466_v44 }
  0xae   : > { %2675 = vmatpush3.bf16.msra.mxu0 %v3045_v52 }
  0xaf   : > { %2676 = vmatprep.subr.bf16.mxu0 %v3046_v55  ;;  %v3071_v55 = vld [vmem:[#allocation7 + $0x98] sm:$0xff]  }
  0xb0   : > { %2764 = vmatpush3.bf16.msra.mxu1 %v3054_v3 }
  0xb1   : > { %2765 = vmatprep.subr.bf16.mxu1 %v3466_v44 }
  0xb2   : > { %2677 = vmatpush3.bf16.msra.mxu0 %v3047_v59  ;;  %v3075_v59 = vld [vmem:[#allocation7 + $0xf8] sm:$0xff]  }
  0xb3   : > { %2678 = vmatprep.subr.bf16.mxu0 %v3048_v60  ;;  %v3076_v60 = vld [vmem:[#allocation7 + $0xf0] sm:$0xff]  }
  0xb4   : > { %2766 = vmatpush3.bf16.msra.mxu1 %v3055_v4 }
  0xb5   : > { %2767 = vmatprep.subr.bf16.mxu1 %v3466_v44 }
  0xb6   : > { %2679 = vmatpush3.bf16.msra.mxu0 %v3049_v61  ;;  %v3077_v61 = vld [vmem:[#allocation7 + $0xe8] sm:$0xff]  }
  0xb7   : > { %2777 = vmatprep.subr.bf16.mxu0 %v3466_v44 }
  0xb8   : > { %2768 = vmatpush3.bf16.msra.mxu1 %v3056_v5 }
  0xb9   : > { %922 = vmatmul.mubr.bf16.vlgmr.msra.gmra.mxu0 %v403_v63  ;;  %2769 = vmatprep.subr.bf16.mxu1 %v3466_v44  ;;  %v3079_v63 = vld [vmem:[#allocation7 + $0xd8] sm:$0xff]  }
  0xba   : > { %2793 = vmatprep.mubr.msk.bf16.mxu0 %vm3467_vm0, %v3466_v44  ;;  %2778 = vmatpush3.bf16.msra.mxu0 %v3059_v8 }
  0xbb   : > { %2779 = vmatprep.subr.bf16.mxu0 %v3466_v44 }
  0xbc   : > { %2770 = vmatpush3.bf16.msra.mxu1 %v3057_v6 }
  0xbd   : > { %2771 = vmatprep.subr.bf16.mxu1 %v3466_v44 }
  0xbe   : > { %2780 = vmatpush3.bf16.msra.mxu0 %v3060_v9 }
  0xbf   : > { %2781 = vmatprep.subr.bf16.mxu0 %v3466_v44 }
  0xc0   : > { %2772 = vmatpush3.bf16.msra.mxu1 %v3058_v7 }
  0xc1   : > { %2797 = vmatprep.subr.bf16.mxu1 %v3466_v44 }
  0xc2   : > { %2782 = vmatpush3.bf16.msra.mxu0 %v3061_v10  ;;  %v3082_v10 = vld [vmem:[#allocation7 + $0xc0] sm:$0xff]  }
  0xc3   : > { %2783 = vmatprep.subr.bf16.mxu0 %v3466_v44 }
  0xc6   : > { %2784 = vmatpush3.bf16.msra.mxu0 %v3062_v37  ;;  %v3094_v37 = vld [vmem:[#allocation7 + $0x160] sm:$0xff]  }
  0xc7   : > { %2785 = vmatprep.subr.bf16.mxu0 %v3466_v44 }
  0xca   : > { %2786 = vmatpush3.bf16.msra.mxu0 %v3063_v38  ;;  %v3095_v38 = vld [vmem:[#allocation7 + $0x158] sm:$0xff]  }
  0xcb   : > { %2787 = vmatprep.subr.bf16.mxu0 %v3466_v44 }
  0xce   : > { %2788 = vmatpush3.bf16.msra.mxu0 %v3064_v39  ;;  %v3096_v39 = vld [vmem:[#allocation7 + $0x150] sm:$0xff]  }
  0xcf   : > { %2789 = vmatprep.subr.bf16.mxu0 %v3466_v44 }
  0xd2   : > { %2790 = vmatpush3.bf16.msra.mxu0 %v3065_v40  ;;  %v3097_v40 = vld [vmem:[#allocation7 + $0x148] sm:$0xff]  }
  0xd3   : > { %2791 = vmatprep.subr.bf16.mxu0 %v3466_v44 }
  0xd6   : > { %2792 = vmatpush3.bf16.msra.mxu0 %v3066_v41  ;;  %v3098_v41 = vld [vmem:[#allocation7 + $0x140] sm:$0xff]  }
  0xd7   : > { %2817 = vmatprep.subr.bf16.mxu0 %v3466_v44 }
 0x159   : > { %v2636_v11 = vpop.f32.mrf.mxu0 }
 0x15b   : > { %v2637_v12 = vpop.f32.mrf.mxu0  ;;  %v2658_v13 = vpop.f32.mrf.mxu1 }
 0x15c   : > { %v2638_v23 = vadd.f32 %v2637_v12, %v2636_v11  ;;  %v3083_v11 = vld [vmem:[#allocation7 + $0x138] sm:$0xff]   ;;  %v3084_v12 = vld [vmem:[#allocation7 + $0x130] sm:$0xff]  }
 0x15d   : > { %v2639_v14 = vpop.f32.mrf.mxu0  ;;  %v2659_v15 = vpop.f32.mrf.mxu1 }
 0x15e   : > { %v844_v25 = vadd.f32 %v2638_v23, %v2447_v24  ;;  %v2660_v26 = vadd.f32 %v2659_v15, %v2658_v13  ;;  %v3085_v13 = vld [vmem:[#allocation7 + $0x128] sm:$0xff]   ;;  %v2516_v14 = vld [vmem:[#allocation8 + $0x2] ss:$0 sm:$0xff]  ;;  %v3088_v23 = vld [vmem:[#allocation7 + $0x110] sm:$0xff]  }
 0x15f   : > { %v2640_v16 = vpop.f32.mrf.mxu0  ;;  %v2661_v17 = vpop.f32.mrf.mxu1  ;;  %v3089_v24 = vld [vmem:[#allocation7 + $0x108] sm:$0xff]  }
 0x160   : > { %v884_v29 = vadd.f32 %v2660_v26, %v844_v25  ;;  %v3090_v25 = vld [vmem:[#allocation7 + $0x100] sm:$0xff]   ;;  %v3091_v26 = vld [vmem:[#allocation7 + $0x178] sm:$0xff]  }
 0x161   : > { %v2662_v18 = vpop.f32.mrf.mxu1 }
 0x163   : > { %v963_v19 = vpop.f32.mrf.mxu1 }
 0x165   : > { %v2755_v20 = vpop.f32.mrf.mxu1 }
 0x167   : > { %v966_v21 = vpop.f32.mrf.mxu1 }
 0x168   : > { %v3086_v21 = vld [vmem:[#allocation7 + $0x120] sm:$0xff]  }
 0x169   : > { %v2756_v22 = vpop.f32.mrf.mxu1 }
 0x16a   : > { %v3087_v22 = vld [vmem:[#allocation7 + $0x118] sm:$0xff]  }
 0x179   : > { %v2680_v27 = vpop.f32.mrf.mxu0 }
 0x17b   : > { %v2681_v28 = vpop.f32.mrf.mxu0 }
 0x17c   : > { %v2682_v30 = vadd.f32 %v2681_v28, %v2680_v27  ;;  %v3092_v27 = vld [vmem:[#allocation7 + $0x170] sm:$0xff]   ;;  %v3093_v28 = vld [vmem:[#allocation7 + $0x168] sm:$0xff]  }
 0x17d   : > { %v2683_v31 = vpop.f32.mrf.mxu0 }
 0x17e   : > { %v924_v32 = vadd.f32 %v2682_v30, %v884_v29  ;;  %v2525_v29 = vld [vmem:[#allocation8 + $0x3] ss:$0 sm:$0xff] }
 0x17f   : > { %v2684_v33 = vpop.f32.mrf.mxu0 }
 0x180   : > { %v964_v34 = vadd.f32 %v963_v19, %v924_v32 }
 0x182   : > { %3179 = vtanh.f32 %v964_v34 }
 0x18f   : > { %v3180_v35 = vpop.eup %3179 }
 0x190   : > { %v970_v36 = vpack.c.bf16 %v3180_v35, %v3180_v35 }
 0x192   : > { %2774 = vmatmul.mubr.bf16.vlgmr.msra.gmra.mxu1 %v970_v36 }
 0x193   : > { %2813 = vmatprep.mubr.msk.bf16.mxu1 %vm3467_vm0, %v3466_v44  ;;  %2798 = vmatpush3.bf16.msra.mxu1 %v3067_v42  ;;  %v3099_v42 = vld [vmem:[#allocation10 + $0x188] ss:$28 sps:$4 sm:$0xff]  }
 0x194   : > { %2799 = vmatprep.subr.bf16.mxu1 %v3466_v44 }
 0x197   : > { %2800 = vmatpush3.bf16.msra.mxu1 %v3068_v43  ;;  %v3101_v43 = vld [vmem:[#allocation10 + $0x18c] ss:$28 sps:$4 sm:$0xff]  }
 0x198   : > { %2801 = vmatprep.subr.bf16.mxu1 %v3466_v44 }
 0x19b   : > { %2802 = vmatpush3.bf16.msra.mxu1 %v3069_v45  ;;  %v3104_v45 = vld [vmem:[#allocation10 + $0x194] ss:$28 sps:$4 sm:$0xff]  }
 0x19c   : > { %2803 = vmatprep.subr.bf16.mxu1 %v3466_v44 }
 0x19f   : > { %2804 = vmatpush3.bf16.msra.mxu1 %v3070_v54 }
 0x1a0   : > { %2805 = vmatprep.subr.bf16.mxu1 %v3466_v44 }
 0x1a3   : > { %2806 = vmatpush3.bf16.msra.mxu1 %v3071_v55 }
 0x1a4   : > { %2807 = vmatprep.subr.bf16.mxu1 %v3466_v44 }
 0x1a7   : > { %2808 = vmatpush3.bf16.msra.mxu1 %v3072_v56 }
 0x1a8   : > { %2809 = vmatprep.subr.bf16.mxu1 %v3466_v44 }
 0x1ab   : > { %2810 = vmatpush3.bf16.msra.mxu1 %v3073_v57 }
 0x1ac   : > { %2811 = vmatprep.subr.bf16.mxu1 %v3466_v44 }
 0x1af   : > { %2812 = vmatpush3.bf16.msra.mxu1 %v3074_v58 }
 0x1b0   : > { %2837 = vmatprep.subr.bf16.mxu1 %v3466_v44 }
 0x252   : > { %v1076_v47 = vpop.f32.mrf.mxu1 }
 0x253   : > { %v1077_v48 = vadd.f32 %v2498_v46, %v1076_v47  ;;  %v3107_v46 = vld [vmem:[#allocation10 + $0x154] ss:$28 sps:$4 sm:$0xff]  }
 0x254   : > { %v2775_v49 = vpop.f32.mrf.mxu1  ;;  %v3105_v47 = vld [vmem:[#allocation10 + $0x150] ss:$28 sps:$4 sm:$0xff]  }
 0x255   : > { %3181 = vtanh.f32 %v1077_v48  ;;  %v3113_v48 = vld [vmem:[#allocation10 + $0x11c] ss:$28 sps:$4 sm:$0xff]  }
 0x256   : > { %v1079_v50 = vpop.f32.mrf.mxu1  ;;  %v3111_v49 = vld [vmem:[#allocation10 + $0x118] ss:$28 sps:$4 sm:$0xff]  }
 0x257   : > { %v3119_v50 = vld [vmem:[#allocation10 + $0xe4] ss:$28 sps:$4 sm:$0xff]  }
 0x258   : > { %v2776_v51 = vpop.f32.mrf.mxu1 }
 0x259   : > { %v3117_v51 = vld [vmem:[#allocation10 + $0xe0] ss:$28 sps:$4 sm:$0xff]  }
 0x262   : > { %v3182_v52 = vpop.eup %3181 }
 0x263   : > { %v1083_v53 = vpack.c.bf16 %v3182_v52, %v3182_v52  ;;  %v2534_v52 = vld [vmem:[#allocation8 + $0x4] ss:$0 sm:$0xff] }
 0x265   : > { %2794 = vmatmul.mubr.bf16.vlgmr.msra.gmra.mxu0 %v1083_v53 }
 0x266   : > { %2833 = vmatprep.mubr.msk.bf16.mxu0 %vm3467_vm0, %v3466_v44  ;;  %2818 = vmatpush3.bf16.msra.mxu0 %v3075_v59  ;;  %v3102_v59 = vld [vmem:[#allocation10 + $0x190] ss:$28 sps:$4 sm:$0xff]  }
 0x267   : > { %2819 = vmatprep.subr.bf16.mxu0 %v3466_v44 }
 0x26a   : > { %2820 = vmatpush3.bf16.msra.mxu0 %v3076_v60 }
 0x26b   : > { %2821 = vmatprep.subr.bf16.mxu0 %v3466_v44 }
 0x26e   : > { %2822 = vmatpush3.bf16.msra.mxu0 %v3077_v61  ;;  %v3110_v61 = vld [vmem:[#allocation10 + $0x15c] ss:$28 sps:$4 sm:$0xff]  }
 0x26f   : > { %2823 = vmatprep.subr.bf16.mxu0 %v3466_v44 }
 0x272   : > { %2824 = vmatpush3.bf16.msra.mxu0 %v3078_v62  ;;  %v3108_v62 = vld [vmem:[#allocation10 + $0x158] ss:$28 sps:$4 sm:$0xff]  }
 0x273   : > { %2825 = vmatprep.subr.bf16.mxu0 %v3466_v44 }
 0x276   : > { %2826 = vmatpush3.bf16.msra.mxu0 %v3079_v63  ;;  %v3116_v63 = vld [vmem:[#allocation10 + $0x124] ss:$28 sps:$4 sm:$0xff]  }
 0x277   : > { %2827 = vmatprep.subr.bf16.mxu0 %v3466_v44 }
 0x27a   : > { %2828 = vmatpush3.bf16.msra.mxu0 %v3080_v0  ;;  %v3114_v0 = vld [vmem:[#allocation10 + $0x120] ss:$28 sps:$4 sm:$0xff]  }
 0x27b   : > { %2829 = vmatprep.subr.bf16.mxu0 %v3466_v44 }
 0x27e   : > { %2830 = vmatpush3.bf16.msra.mxu0 %v3081_v1  ;;  %v3122_v1 = vld [vmem:[#allocation10 + $0xec] ss:$28 sps:$4 sm:$0xff]  }
 0x27f   : > { %2831 = vmatprep.subr.bf16.mxu0 %v3466_v44 }
 0x282   : > { %2832 = vmatpush3.bf16.msra.mxu0 %v3082_v10  ;;  %v3132_v10 = vld [vmem:[#allocation10 + $0x78] ss:$28 sps:$4 sm:$0xff]  }
 0x283   : > { %2857 = vmatprep.subr.bf16.mxu0 %v3466_v44 }
 0x325   : > { %v1191_v3 = vpop.f32.mrf.mxu0 }
 0x326   : > { %v1192_v4 = vadd.f32 %v2507_v2, %v1191_v3  ;;  %v3120_v2 = vld [vmem:[#allocation10 + $0xe8] ss:$28 sps:$4 sm:$0xff]  }
 0x327   : > { %v2795_v5 = vpop.f32.mrf.mxu0  ;;  %v3125_v3 = vld [vmem:[#allocation10 + $0xac] ss:$28 sps:$4 sm:$0xff]  }
 0x328   : > { %3183 = vtanh.f32 %v1192_v4  ;;  %v3128_v4 = vld [vmem:[#allocation10 + $0xb4] ss:$28 sps:$4 sm:$0xff]   ;;  %v3123_v5 = vld [vmem:[#allocation10 + $0xa8] ss:$28 sps:$4 sm:$0xff]  }
 0x329   : > { %v1194_v6 = vpop.f32.mrf.mxu0 }
 0x32a   : > { %v3126_v6 = vld [vmem:[#allocation10 + $0xb0] ss:$28 sps:$4 sm:$0xff]  }
 0x32b   : > { %v2796_v7 = vpop.f32.mrf.mxu0 }
 0x32c   : > { %v3131_v7 = vld [vmem:[#allocation10 + $0x74] ss:$28 sps:$4 sm:$0xff]  }
 0x335   : > { %v3184_v8 = vpop.eup %3183 }
 0x336   : > { %v1198_v9 = vpack.c.bf16 %v3184_v8, %v3184_v8  ;;  %v3134_v8 = vld [vmem:[#allocation10 + $0x7c] ss:$28 sps:$4 sm:$0xff]  }
 0x338   : > { %2814 = vmatmul.mubr.bf16.vlgmr.msra.gmra.mxu1 %v1198_v9  ;;  %v3129_v9 = vld [vmem:[#allocation10 + $0x70] ss:$28 sps:$4 sm:$0xff]  }
 0x339   : > { %2853 = vmatprep.mubr.msk.bf16.mxu1 %vm3467_vm0, %v3466_v44  ;;  %2838 = vmatpush3.bf16.msra.mxu1 %v3083_v11  ;;  %v3137_v11 = vld [vmem:[#allocation10 + $0x3c] ss:$28 sps:$4 sm:$0xff]  }
 0x33a   : > { %2839 = vmatprep.subr.bf16.mxu1 %v3466_v44 }
 0x33d   : > { %2840 = vmatpush3.bf16.msra.mxu1 %v3084_v12  ;;  %v3140_v12 = vld [vmem:[#allocation10 + $0x44] ss:$28 sps:$4 sm:$0xff]  }
 0x33e   : > { %2841 = vmatprep.subr.bf16.mxu1 %v3466_v44 }
 0x341   : > { %2842 = vmatpush3.bf16.msra.mxu1 %v3085_v13  ;;  %v3135_v13 = vld [vmem:[#allocation10 + $0x38] ss:$28 sps:$4 sm:$0xff]  }
 0x342   : > { %2843 = vmatprep.subr.bf16.mxu1 %v3466_v44 }
 0x345   : > { %2844 = vmatpush3.bf16.msra.mxu1 %v3086_v21  ;;  %v2543_v21 = vld [vmem:[#allocation8 + $0x5] ss:$0 sm:$0xff] }
 0x346   : > { %2845 = vmatprep.subr.bf16.mxu1 %v3466_v44 }
 0x349   : > { %2846 = vmatpush3.bf16.msra.mxu1 %v3087_v22 }
 0x34a   : > { %2847 = vmatprep.subr.bf16.mxu1 %v3466_v44 }
 0x34d   : > { %2848 = vmatpush3.bf16.msra.mxu1 %v3088_v23 }
 0x34e   : > { %2849 = vmatprep.subr.bf16.mxu1 %v3466_v44 }
 0x351   : > { %2850 = vmatpush3.bf16.msra.mxu1 %v3089_v24 }
 0x352   : > { %2851 = vmatprep.subr.bf16.mxu1 %v3466_v44 }
 0x355   : > { %2852 = vmatpush3.bf16.msra.mxu1 %v3090_v25 }
 0x356   : > { %2048 = vmatprep.subr.bf16.mxu1 %v3101_v43  ;;  %v3169_v43 = vld [vmem:[#allocation10 + $0x84] ss:$28 sps:$4 sm:$0xff]  }
 0x3f8   : > { %v1306_v15 = vpop.f32.mrf.mxu1 }
 0x3f9   : > { %v1307_v16 = vadd.f32 %v2516_v14, %v1306_v15  ;;  %v3138_v14 = vld [vmem:[#allocation10 + $0x40] ss:$28 sps:$4 sm:$0xff]  }
 0x3fa   : > { %v2815_v17 = vpop.f32.mrf.mxu1  ;;  %v3143_v15 = vld [vmem:[#allocation10 + $0x4] ss:$28 sps:$4 sm:$0xff]  }
 0x3fb   : > { %1312 = vst [vmem:[%s3739_s19] sm:$0xff] %v1307_v16  ;;  %v1313_v18 = vpack.c.bf16 %v1307_v16, %v1307_v16  ;;  %v3146_v16 = vld [vmem:[#allocation10 + $0xc] ss:$28 sps:$4 sm:$0xff]   ;;  %v3141_v17 = vld [vmem:[#allocation10] ss:$28 sps:$4 sm:$0xff]  }
 0x3fc   : > { %v1309_v19 = vpop.f32.mrf.mxu1 }
 0x3fd   : > { %2834 = vmatmul.mubr.bf16.vlgmr.msra.gmra.mxu0 %v1313_v18  ;;  %v3144_v18 = vld [vmem:[#allocation10 + $0x8] ss:$28 sps:$4 sm:$0xff]   ;;  %v3149_v19 = vld [vmem:[#allocation10 + $0x19c] ss:$28 sps:$4 sm:$0xff]  }
 0x3fe   : > { %v2816_v20 = vpop.f32.mrf.mxu1  ;;  %2873 = vmatprep.mubr.msk.bf16.mxu0 %vm3467_vm0, %v3466_v44  ;;  %2858 = vmatpush3.bf16.msra.mxu0 %v3091_v26 }
 0x3ff   : > { %2859 = vmatprep.subr.bf16.mxu0 %v3466_v44  ;;  %v3468_v20 = vmov 0  }
 0x402   : > { %2860 = vmatpush3.bf16.msra.mxu0 %v3092_v27 }
 0x403   : > { %2861 = vmatprep.subr.bf16.mxu0 %v3466_v44 }
 0x406   : > { %2862 = vmatpush3.bf16.msra.mxu0 %v3093_v28  ;;  %v3147_v28 = vld [vmem:[#allocation10 + $0x198] ss:$28 sps:$4 sm:$0xff]  }
 0x407   : > { %2863 = vmatprep.subr.bf16.mxu0 %v3466_v44 }
 0x40a   : > { %2864 = vmatpush3.bf16.msra.mxu0 %v3094_v37  ;;  %v3161_v37 = vld [vmem:[#allocation10 + $0xf4] ss:$28 sps:$4 sm:$0xff]  }
 0x40b   : > { %2865 = vmatprep.subr.bf16.mxu0 %v3466_v44 }
 0x40e   : > { %2866 = vmatpush3.bf16.msra.mxu0 %v3095_v38  ;;  %v3159_v38 = vld [vmem:[#allocation10 + $0xf0] ss:$28 sps:$4 sm:$0xff]  }
 0x40f   : > { %2867 = vmatprep.subr.bf16.mxu0 %v3466_v44 }
 0x412   : > { %2868 = vmatpush3.bf16.msra.mxu0 %v3096_v39  ;;  %v3162_v39 = vld [vmem:[#allocation10 + $0xf8] ss:$28 sps:$4 sm:$0xff]  }
 0x413   : > { %2869 = vmatprep.subr.bf16.mxu0 %v3466_v44 }
 0x416   : > { %2870 = vmatpush3.bf16.msra.mxu0 %v3097_v40  ;;  %v3165_v40 = vld [vmem:[#allocation10 + $0xbc] ss:$28 sps:$4 sm:$0xff]  }
 0x417   : > { %2871 = vmatprep.subr.bf16.mxu0 %v3466_v44 }
 0x41a   : > { %2872 = vmatpush3.bf16.msra.mxu0 %v3098_v41  ;;  %v3163_v41 = vld [vmem:[#allocation10 + $0xb8] ss:$28 sps:$4 sm:$0xff]  }
 0x41b   : > { %2089 = vmatprep.subr.bf16.mxu0 %v3104_v45  ;;  %v3167_v45 = vld [vmem:[#allocation10 + $0x80] ss:$28 sps:$4 sm:$0xff]  }
 0x4bd   : > { %v1421_v30 = vpop.f32.mrf.mxu0 }
 0x4be   : > { %v1422_v31 = vadd.f32 %v2525_v29, %v1421_v30  ;;  %v3150_v29 = vld [vmem:[#allocation10 + $0x1a0] ss:$28 sps:$4 sm:$0xff]  }
 0x4bf   : > { %v2835_v32 = vpop.f32.mrf.mxu0 }
 0x4c0   : > { %3185 = vtanh.f32 %v1422_v31  ;;  %v3153_v31 = vld [vmem:[#allocation10 + $0x164] ss:$28 sps:$4 sm:$0xff]  }
 0x4c1   : > { %v1424_v33 = vpop.f32.mrf.mxu0  ;;  %v3151_v32 = vld [vmem:[#allocation10 + $0x160] ss:$28 sps:$4 sm:$0xff]  }
 0x4c2   : > { %v3154_v33 = vld [vmem:[#allocation10 + $0x168] ss:$28 sps:$4 sm:$0xff]  }
 0x4c3   : > { %v2836_v34 = vpop.f32.mrf.mxu0 }
 0x4c4   : > { %v3157_v34 = vld [vmem:[#allocation10 + $0x12c] ss:$28 sps:$4 sm:$0xff]  }
 0x4cd   : > { %v3186_v35 = vpop.eup %3185 }
 0x4ce   : > { %v1428_v36 = vpack.c.bf16 %v3186_v35, %v3186_v35  ;;  %v3155_v35 = vld [vmem:[#allocation10 + $0x128] ss:$28 sps:$4 sm:$0xff]  }
 0x4d0   : > { %2854 = vmatmul.mubr.bf16.vlgmr.msra.gmra.mxu1 %v1428_v36  ;;  %v3158_v36 = vld [vmem:[#allocation10 + $0x130] ss:$28 sps:$4 sm:$0xff]  }
 0x4d1   : > { %2049 = vmatpush1.bf16.msra.mxu1 %v3099_v42  ;;  %2080 = vmatprep.mubr.bf16.mxu1 %v3468_v20  ;;  %v3166_v42 = vld [vmem:[#allocation10 + $0xc0] ss:$28 sps:$4 sm:$0xff]  }
 0x4d2   : > { %2050 = vmatprep.subr.bf16.mxu1 %v3107_v46  ;;  %v3170_v46 = vld [vmem:[#allocation10 + $0x88] ss:$28 sps:$4 sm:$0xff]  }
 0x4d5   : > { %2051 = vmatpush1.bf16.msra.mxu1 %v3105_v47  ;;  %v3173_v47 = vld [vmem:[#allocation10 + $0x4c] ss:$28 sps:$4 sm:$0xff]  }
 0x4d6   : > { %2052 = vmatprep.subr.bf16.mxu1 %v3113_v48  ;;  %v3171_v48 = vld [vmem:[#allocation10 + $0x48] ss:$28 sps:$4 sm:$0xff]  }
 0x4d9   : > { %2053 = vmatpush1.bf16.msra.mxu1 %v3111_v49  ;;  %v3174_v49 = vld [vmem:[#allocation10 + $0x50] ss:$28 sps:$4 sm:$0xff]  }
 0x4da   : > { %2054 = vmatprep.subr.bf16.mxu1 %v3119_v50  ;;  %v3177_v50 = vld [vmem:[#allocation10 + $0x14] ss:$28 sps:$4 sm:$0xff]  }
 0x4dd   : > { %2055 = vmatpush1.bf16.msra.mxu1 %v3117_v51  ;;  %v3175_v51 = vld [vmem:[#allocation10 + $0x10] ss:$28 sps:$4 sm:$0xff]  }
 0x4de   : > { %2056 = vmatprep.subr.bf16.mxu1 %v3125_v3 }
 0x4e1   : > { %2057 = vmatpush1.bf16.msra.mxu1 %v3123_v5 }
 0x4e2   : > { %2058 = vmatprep.subr.bf16.mxu1 %v3131_v7 }
 0x4e5   : > { %2059 = vmatpush1.bf16.msra.mxu1 %v3129_v9 }
 0x4e6   : > { %2060 = vmatprep.subr.bf16.mxu1 %v3137_v11 }
 0x4e9   : > { %2061 = vmatpush1.bf16.msra.mxu1 %v3135_v13 }
 0x4ea   : > { %2062 = vmatprep.subr.bf16.mxu1 %v3143_v15 }
 0x4ed   : > { %2063 = vmatpush1.bf16.msra.mxu1 %v3141_v17 }
 0x4ee   : > { %2130 = vmatprep.subr.bf16.mxu1 %v3149_v19 }
 0x590   : > { %v1536_v53 = vpop.f32.mrf.mxu1 }
 0x591   : > { %v1537_v54 = vadd.f32 %v2534_v52, %v1536_v53  ;;  %v3178_v52 = vld [vmem:[#allocation10 + $0x18] ss:$28 sps:$4 sm:$0xff]  }
 0x592   : > { %v2855_v55 = vpop.f32.mrf.mxu1 }
 0x593   : > { %3187 = vtanh.f32 %v1537_v54 }
 0x594   : > { %v1539_v56 = vpop.f32.mrf.mxu1 }
 0x596   : > { %v2856_v57 = vpop.f32.mrf.mxu1 }
 0x5a0   : > { %v3188_v58 = vpop.eup %3187 }
 0x5a1   : > { %v1543_v60 = vpack.c.bf16 %v3188_v58, %v3188_v58 }
 0x5a3   : > { %2874 = vmatmul.mubr.bf16.vlgmr.msra.gmra.mxu0 %v1543_v60 }
 0x5a4   : > { %2090 = vmatpush1.bf16.msra.mxu0 %v3102_v59  ;;  %2121 = vmatprep.mubr.bf16.mxu0 %v3468_v20 }
 0x5a5   : > { %2091 = vmatprep.subr.bf16.mxu0 %v3110_v61 }
 0x5a8   : > { %2092 = vmatpush1.bf16.msra.mxu0 %v3108_v62 }
 0x5a9   : > { %2093 = vmatprep.subr.bf16.mxu0 %v3116_v63 }
 0x5ac   : > { %2094 = vmatpush1.bf16.msra.mxu0 %v3114_v0 }
 0x5ad   : > { %2095 = vmatprep.subr.bf16.mxu0 %v3122_v1 }
 0x5b0   : > { %2096 = vmatpush1.bf16.msra.mxu0 %v3120_v2 }
 0x5b1   : > { %2097 = vmatprep.subr.bf16.mxu0 %v3128_v4 }
 0x5b4   : > { %2098 = vmatpush1.bf16.msra.mxu0 %v3126_v6 }
 0x5b5   : > { %2099 = vmatprep.subr.bf16.mxu0 %v3134_v8 }
 0x5b8   : > { %2100 = vmatpush1.bf16.msra.mxu0 %v3132_v10 }
 0x5b9   : > { %2101 = vmatprep.subr.bf16.mxu0 %v3140_v12 }
 0x5bc   : > { %2102 = vmatpush1.bf16.msra.mxu0 %v3138_v14 }
 0x5bd   : > { %2103 = vmatprep.subr.bf16.mxu0 %v3146_v16 }
 0x5c0   : > { %2104 = vmatpush1.bf16.msra.mxu0 %v3144_v18 }
 0x5c1   : > { %2877 = vmatprep.subr.bf16.mxu0 %v3466_v44 }
 0x663   : > { %v1651_v22 = vpop.f32.mrf.mxu0 }
 0x664   : > { %v1652_v23 = vadd.f32 %v2543_v21, %v1651_v22 }
 0x665   : > { %v2875_v24 = vpop.f32.mrf.mxu0 }
 0x666   : > { %3189 = vtanh.f32 %v1652_v23 }
 0x667   : > { %v1654_v25 = vpop.f32.mrf.mxu0 }
 0x669   : > { %v2876_v26 = vpop.f32.mrf.mxu0 }
 0x673   : > { %v3190_v27 = vpop.eup %3189 }
 0x674   : > { %v1658_v30 = vpack.c.bf16 %v3190_v27, %v3190_v27 }
 0x676   : > { %2081 = vmatmul.mubr.bf16.vlgmr.msra.gmra.mxu1 %v1658_v30  ;;  %2122 = vmatmul.mubr.bf16.vlgmr.msra.gmra.mxu0 %v1658_v30 }
 0x677   : > { %2131 = vmatpush1.bf16.msra.mxu1 %v3147_v28  ;;  %2878 = vmatpush3.bf16.msra.mxu0 %v3150_v29 }
 0x678   : > { %2132 = vmatprep.subr.bf16.mxu1 %v3153_v31  ;;  %2879 = vmatprep.subr.bf16.mxu0 %v3466_v44 }
 0x679   : > { %2162 = vmatprep.mubr.bf16.mxu1 %v3468_v20  ;;  %2893 = vmatprep.mubr.msk.bf16.mxu0 %vm3467_vm0, %v3466_v44 }
 0x67b   : > { %2133 = vmatpush1.bf16.msra.mxu1 %v3151_v32  ;;  %2880 = vmatpush3.bf16.msra.mxu0 %v3154_v33 }
 0x67c   : > { %2134 = vmatprep.subr.bf16.mxu1 %v3157_v34  ;;  %2881 = vmatprep.subr.bf16.mxu0 %v3466_v44 }
 0x67f   : > { %2135 = vmatpush1.bf16.msra.mxu1 %v3155_v35  ;;  %2882 = vmatpush3.bf16.msra.mxu0 %v3158_v36 }
 0x680   : > { %2136 = vmatprep.subr.bf16.mxu1 %v3161_v37  ;;  %2883 = vmatprep.subr.bf16.mxu0 %v3466_v44 }
 0x683   : > { %2137 = vmatpush1.bf16.msra.mxu1 %v3159_v38  ;;  %2884 = vmatpush3.bf16.msra.mxu0 %v3162_v39 }
 0x684   : > { %2138 = vmatprep.subr.bf16.mxu1 %v3165_v40  ;;  %2885 = vmatprep.subr.bf16.mxu0 %v3466_v44 }
 0x687   : > { %2139 = vmatpush1.bf16.msra.mxu1 %v3163_v41  ;;  %2886 = vmatpush3.bf16.msra.mxu0 %v3166_v42 }
 0x688   : > { %2140 = vmatprep.subr.bf16.mxu1 %v3169_v43  ;;  %2887 = vmatprep.subr.bf16.mxu0 %v3466_v44 }
 0x68b   : > { %2141 = vmatpush1.bf16.msra.mxu1 %v3167_v45  ;;  %2888 = vmatpush3.bf16.msra.mxu0 %v3170_v46 }
 0x68c   : > { %2142 = vmatprep.subr.bf16.mxu1 %v3173_v47  ;;  %2889 = vmatprep.subr.bf16.mxu0 %v3466_v44 }
 0x68f   : > { %2143 = vmatpush1.bf16.msra.mxu1 %v3171_v48  ;;  %2890 = vmatpush3.bf16.msra.mxu0 %v3174_v49 }
 0x690   : > { %2144 = vmatprep.subr.bf16.mxu1 %v3177_v50  ;;  %2891 = vmatprep.subr.bf16.mxu0 %v3466_v44 }
 0x693   : > { %2145 = vmatpush1.bf16.msra.mxu1 %v3175_v51  ;;  %2892 = vmatpush3.bf16.msra.mxu0 %v3178_v52 }
 0x696   : > { %2163 = vmatmul.mubr.bf16.vlgmr.msra.gmra.mxu1 %v1658_v30  ;;  %2894 = vmatmul.mubr.bf16.vlgmr.msra.gmra.mxu0 %v1658_v30 }
 0x697   : > { %3364 = shalt.err (!%p3361_p11)
}
 0x698   : > { %s3365_s12 = scalar_lea.hbm %s2277_s17, 128  ;;  %s3369_s19 = scalar_lea.hbm %s3852_s7, 256 }
 0x699   : > { %p3366_p12 = scmp.ne.s32.totalorder %s2277_s17, %s3365_s12  ;;  %p3370_p4 = scmp.lt.s32.totalorder %s2277_s17, %s3852_s7 }
 0x69a   : > { %p3371_p13 = scmp.lt.s32.totalorder %s3369_s19, %s3365_s12 }
 0x69b   : > { %p3367_p1 = pnand %p3366_p12, %p3876_p7 }
 0x69c   : > { %p3372_p2 = por %p3371_p13, %p3370_p4 }
 0x69d   : > { %p3368_p3 = pneg %p3367_p1 }
 0x69f   : > { %p3373_p8 = pnand %p3372_p2, %p3368_p3 }
 0x6a1   : > { %3376 = shalt.err (!%p3373_p8)
}
 0x6a2   : > { %2919 = dma.vmem_to_hbm [thread:$0]  (%p3876_p7), %s2280_s18, 128, %s2277_s17, %s2261_s14   ;;  %v1725_v44 = vlaneseq  ;;  %v1723_v56 = vld [vmem:[%s3851_s6] sm:$0xff] }
 0x6a3   : > { %s3788_s17 = scalar_lea.vmem [#allocation12], %s2899_s3  ;;  %s2900_s3 = smul.u32 896, %s3537_s11 }
 0x6a4   : > { %v1726_v53 = vshrl.u32 %v1725_v44, 7  ;;  %s2293_s18 = sshll.u32 %s3788_s17, 4  ;;  %s2266_s4 = scalar_lea.sflag [#allocation13], %s3658_s1  ;;  %s3802_s18 = int_to_ptr.vmem [resolvable:$true] %s2293_s18 }
 0x6a5   : > { %s3800_s26 = scalar_lea.hbm %s3853_s8, %s2900_s3  ;;  %s3377_s12 = scalar_lea.vmem %s3802_s18, 896 }
 0x6a6   : > { %v1727_v54 = vsub.s32 0, %v1726_v53  ;;  %v1735_v55 = vsub.s32 2, %v1726_v53  ;;  %v1731_v57 = vsub.s32 1, %v1726_v53  ;;  %v1739_v58 = vsub.s32 3, %v1726_v53  ;;  %p3378_p10 = scmp.ne.s32.totalorder %s3802_s18, %s3377_s12  ;;  %s3470_s11 = smov [#allocation12]  }
 0x6a7   : > { %v1743_v23 = vsub.s32 4, %v1726_v53  ;;  %v1751_v24 = vsub.s32 6, %v1726_v53  ;;  %v1747_v25 = vsub.s32 5, %v1726_v53  ;;  %s3381_s15 = sshll.u32 %s3470_s11, 4  ;;  %s3382_s15 = int_to_ptr.vmem [resolvable:$false] %s3381_s15 }
 0x6a8   : > { %v1728_v59 = vrot.slane %v1723_v56, %v1727_v54  ;;  %v1736_v60 = vrot.slane %v1723_v56, %v1735_v55  ;;  %v1732_v61 = vrot.slane %v1723_v56, %v1731_v57  ;;  %v1740_v62 = vrot.slane %v1723_v56, %v1739_v58  ;;  %p3379_p6 = pnand %p3378_p10, %p3876_p7  ;;  %s3383_s21 = scalar_lea.vmem %s3382_s15, 1792 }
 0x6a9   : > { %v1744_v26 = vrot.slane %v1723_v56, %v1743_v23  ;;  %v1752_v27 = vrot.slane %v1723_v56, %v1751_v24  ;;  %v1748_v28 = vrot.slane %v1723_v56, %v1747_v25  ;;  %p3384_p5 = scmp.lt.s32.totalorder %s3802_s18, %s3382_s15  ;;  %p3385_p9 = scmp.lt.s32.totalorder %s3383_s21, %s3377_s12 }
 0x6aa   : > { %p3380_p0 = pneg %p3379_p6 }
 0x6ab   : > { %p3386_p11 = por %p3385_p9, %p3384_p5 }
 0x6ad   : > { %p3387_p12 = pnand %p3386_p11, %p3380_p0 }
 0x736   : > { %v2082_v63 = vpop.f32.mrf.mxu1  ;;  %v2123_v0 = vpop.f32.mrf.mxu0 }
 0x737   : > { %v2083_v1 = vadd.f32 %v2082_v63, %v1728_v59  ;;  %v2124_v2 = vadd.f32 %v2123_v0, %v1736_v60 }
 0x738   : > { %v2084_v3 = vpop.f32.mrf.mxu1  ;;  %v2125_v4 = vpop.f32.mrf.mxu0 }
 0x739   : > { %v2608_v5 = vmul.f32 -1.442695, %v2083_v1  ;;  %v2610_v6 = vmul.f32 -1.442695, %v2124_v2  ;;  %v2085_v7 = vadd.f32 %v2084_v3, %v1732_v61  ;;  %v2126_v8 = vadd.f32 %v2125_v4, %v1740_v62 }
 0x73a   : > { %v2086_v9 = vpop.f32.mrf.mxu1  ;;  %v2127_v10 = vpop.f32.mrf.mxu0 }
 0x73b   : > { %3191 = vpow2.f32 %v2608_v5  ;;  %v2609_v11 = vmul.f32 -1.442695, %v2085_v7  ;;  %v2611_v12 = vmul.f32 -1.442695, %v2126_v8 }
 0x73c   : > { %3193 = vpow2.f32 %v2610_v6  ;;  %v2087_v13 = vpop.f32.mrf.mxu1  ;;  %v2128_v14 = vpop.f32.mrf.mxu0 }
 0x73d   : > { %3195 = vpow2.f32 %v2609_v11 }
 0x73e   : > { %3197 = vpow2.f32 %v2611_v12 }
 0x748   : > { %v3192_v15 = vpop.eup %3191 }
 0x749   : > { %v3194_v16 = vpop.eup %3193  ;;  %v2232_v17 = vadd.f32 1.0, %v3192_v15 }
 0x74a   : > { %v3196_v18 = vpop.eup %3195  ;;  %v2234_v19 = vadd.f32 1.0, %v3194_v16 }
 0x74b   : > { %v3198_v20 = vpop.eup %3197  ;;  %3199 = vrcp.f32 %v2232_v17  ;;  %v2233_v21 = vadd.f32 1.0, %v3196_v18 }
 0x74c   : > { %3201 = vrcp.f32 %v2234_v19  ;;  %v2235_v22 = vadd.f32 1.0, %v3198_v20 }
 0x74d   : > { %3203 = vrcp.f32 %v2233_v21 }
 0x74e   : > { %3205 = vrcp.f32 %v2235_v22 }
 0x756   : > { %v2164_v29 = vpop.f32.mrf.mxu1  ;;  %v2205_v30 = vpop.f32.mrf.mxu0 }
 0x757   : > { %v2165_v31 = vadd.f32 %v2164_v29, %v1744_v26  ;;  %v2206_v32 = vadd.f32 %v2205_v30, %v1752_v27 }
 0x758   : > { %v3200_v33 = vpop.eup %3199  ;;  %v2166_v34 = vpop.f32.mrf.mxu1 }
 0x759   : > { %v2895_v35 = vpop.f32.mrf.mxu0  ;;  %v3202_v36 = vpop.eup %3201  ;;  %v2612_v37 = vmul.f32 -1.442695, %v2165_v31  ;;  %v2614_v38 = vmul.f32 -1.442695, %v2206_v32  ;;  %v2167_v39 = vadd.f32 %v2166_v34, %v1748_v28  ;;  %2253 = vst [vmem:[%s3788_s17] sm:$0xff] %v3200_v33 }
 0x75a   : > { %v3204_v40 = vpop.eup %3203  ;;  %v2168_v41 = vpop.f32.mrf.mxu1  ;;  %2255 = vst [vmem:[%s3788_s17 + $0x10] sm:$0xff] %v3202_v36 }
 0x75b   : > { %v2208_v42 = vpop.f32.mrf.mxu0  ;;  %v3206_v43 = vpop.eup %3205  ;;  %3207 = vpow2.f32 %v2612_v37  ;;  %v2613_v45 = vmul.f32 -1.442695, %v2167_v39  ;;  %2254 = vst [vmem:[%s3788_s17 + $0x8] sm:$0xff] %v3204_v40 }
 0x75c   : > { %3209 = vpow2.f32 %v2614_v38  ;;  %v2169_v46 = vpop.f32.mrf.mxu1  ;;  %2256 = vst [vmem:[%s3788_s17 + $0x18] sm:$0xff] %v3206_v43 }
 0x75d   : > { %v2896_v47 = vpop.f32.mrf.mxu0  ;;  %3211 = vpow2.f32 %v2613_v45 }
 0x768   : > { %v3208_v48 = vpop.eup %3207 }
 0x769   : > { %v3210_v49 = vpop.eup %3209  ;;  %v2236_v50 = vadd.f32 1.0, %v3208_v48 }
 0x76a   : > { %v3212_v51 = vpop.eup %3211  ;;  %v2238_v52 = vadd.f32 1.0, %v3210_v49 }
 0x76b   : > { %3213 = vrcp.f32 %v2236_v50  ;;  %v2237_v44 = vadd.f32 1.0, %v3212_v51 }
 0x76c   : > { %3215 = vrcp.f32 %v2238_v52 }
 0x76d   : > { %3217 = vrcp.f32 %v2237_v44 }
 0x778   : > { %v3214_v53 = vpop.eup %3213 }
 0x779   : > { %v3216_v54 = vpop.eup %3215  ;;  %2257 = vst [vmem:[%s3788_s17 + $0x20] sm:$0xff] %v3214_v53 }
 0x77a   : > { %v3218_v55 = vpop.eup %3217  ;;  %2259 = vst [vmem:[%s3788_s17 + $0x30] sm:$0xff] %v3216_v54 }
 0x77b   : > { %2258 = vst [vmem:[%s3788_s17 + $0x28] sm:$0xff] %v3218_v55 }
 0x77c   : > { %3390 = shalt.err (!%p3387_p12)
}
 0x77d   : > { %s3391_s19 = scalar_lea.hbm %s3800_s26, 896  ;;  %s3395_s25 = scalar_lea.hbm %s3853_s8, 1792 }
 0x77e   : > { %p3392_p1 = scmp.ne.s32.totalorder %s3800_s26, %s3391_s19  ;;  %p3396_p13 = scmp.lt.s32.totalorder %s3800_s26, %s3853_s8 }
 0x77f   : > { %p3397_p2 = scmp.lt.s32.totalorder %s3395_s25, %s3391_s19 }
 0x780   : > { %p3393_p3 = pnand %p3392_p1, %p3876_p7 }
 0x781   : > { %p3398_p8 = por %p3397_p2, %p3396_p13 }
 0x782   : > { %p3394_p4 = pneg %p3393_p3 }
 0x784   : > { %p3399_p10 = pnand %p3398_p8, %p3394_p4 }
 0x786   : > { %3402 = shalt.err (!%p3399_p10)
}
 0x787   : > { %2920 = dma.vmem_to_hbm [thread:$0]  (%p3876_p7), %s3802_s18, 896, %s3800_s26, %s2266_s4  }
 0x788 PF: > { %s2305_s17 = sand.u32 1, %s3441_s27   ;;  %p3877_p6 = scmp.ne.s32.totalorder %s3868_s16, 0 }
 0x789   : > { %p3878_p0 = scmp.ge.s32.totalorder %s3453_s30, 2  ;;  %s2306_s3 = scalar_lea.sflag [#allocation4], %s2305_s17 }
 0x78b   : > { %p2941_p5 = pnand %p3878_p0, %p3877_p6 }
 0x78d   : > { %p2942_p9 = pneg %p2941_p5 }
 0x78f   : > { %3432 = dma.done.wait (%p2942_p9), %s2306_s3, 128  }
 0x790   : > { %3434 = vsyncadd (%p2942_p9), %s2306_s3, 4294967168  ;;  %s2315_s14 = scalar_lea.sflag [#allocation13], %s2305_s17 }
 0x791   : > { %3436 = dma.done.wait (%p2942_p9), %s2315_s14, 896  }
 0x792   : > { %3438 = vsyncadd (%p2942_p9), %s2315_s14, 4294966400  ;;  %p27_p7 = scmp.ge.s32.totalorder %s3601_s24, 4   ;;  %s3879_s27 = smov %s3445_s28 }
 0x793   : > { %s3880_s28 = smov %s3449_s29  ;;  %s3881_s29 = smov %s3612_s9 }
 0x794   : > { %s3882_s30 = smov %s3601_s24  ;;  %29 = sbr.rel (!%p27_p7) target bundleno = 13 (0xd), region = 136 }
 0x799   :  { %2320 = vsyncpa [#allocation3], 1 }
 0x79a   :  { %2322 = vsyncpa [#allocation3 + $0x1], 1 }
 0x79b   :  { %2323 = vsyncpa [#allocation6], 1 }
 0x79c   :  { %2324 = vsyncpa [#allocation9], 1 }
 0x79d   :  { %2325 = vsyncpa [#allocation4], 1 }
 0x79e   :  { %2327 = vsyncpa [#allocation4 + $0x1], 1 }
 0x79f   :  { %2328 = vsyncpa [#allocation13], 1 }
 0x7a0   :  { %2330 = vsyncpa [#allocation13 + $0x1], 1 }

</bundles_post_ra>
